<compile_context>
chip_gen: v6e
topology: v6e:2x2x1
jax: 0.10.0
libtpu: 0.0.40
codegen_flags: <defaults>
</compile_context>

<pallas_src>
import functools
import math

import numpy as np

import jax
import jax.numpy as jnp
from jax.experimental import pallas as pl
from jax.experimental.pallas import tpu as pltpu


_LANES = 128
_F32 = 4
_MAX_PACK = 16                        # cap segment-matmul MACs/element (op is memory-bound)
_HP = jax.lax.Precision.HIGHEST       # seg/segt entries are exactly 0/1 -> stats stay f32-exact


@functools.lru_cache(maxsize=None)
def _vmem_budget_and_limit():
    """(accounted-bytes budget per block set, vmem_limit_bytes) from physical VMEM."""
    cap = 64 << 20                                      # v7x-safe fallback
    try:
        info = pltpu.get_tpu_info()
        cap_attr = getattr(info, "vmem_capacity_bytes", None)
        if cap_attr:
            cap = int(cap_attr)
    except Exception:  # pragma: no cover - conservative fallback off-TPU / older APIs
        pass
    budget = min(48 << 20, (cap * 3) // 8)              # v5e/v6e: 48 MiB, v7x: 24 MiB
    limit = min(max(2 * budget, 32 << 20), (cap * 3) // 4)
    return budget, limit


def _compiler_params(sem, limit):
    return pltpu.CompilerParams(dimension_semantics=sem, vmem_limit_bytes=int(limit))


def _row_tile(rows, row_io_bytes, row_f32_bytes, budget):
    """Rows per block: budget covers double-buffered in/out + ~6 f32 full-tile temps."""
    per_row = 4 * row_io_bytes + 6 * row_f32_bytes
    tm = max(1, budget // max(per_row, 1))
    if tm >= rows:
        return rows                                     # single full-extent block
    tm = max(8, (tm // 8) * 8)
    if pl.cdiv(rows, tm) < 4:                           # keep >=~4 steps (v7x megacore/overlap)
        tm = max(8, (pl.cdiv(rows, 4) // 8) * 8)
    return tm


def _cfirst_tiles(bsz, c, hw, itemsize, budget):
    """(images per block, hw lane tile) for the NCHW kernel, same VMEM accounting."""
    per_elem = 4 * itemsize + 6 * _F32
    max_elems = max(1, budget // per_elem)
    img = c * hw
    if img <= max_elems:
        t = hw
        nb = min(bsz, max(1, max_elems // img))
    else:
        nb = 1
        t = min(hw, max(_LANES, ((max_elems // c) // _LANES) * _LANES))
    if nb < bsz and pl.cdiv(bsz, nb) * pl.cdiv(hw, t) < 4:
        nb = max(1, pl.cdiv(bsz, 4))                    # keep >=~4 steps for v7x megacore
    return nb, t


# --------------------------------- kernels -----------------------------------


def _ln_last_packed_kernel(x_ref, w_ref, b_ref, seg_ref, segt_ref, o_ref, *, eps, c):
    # x_ref: (TM, P*C) -- P logical rows packed per 128-lane row (lane-dense I/O).
    x = x_ref[...].astype(jnp.float32)
    seg = seg_ref[...]                     # (P*C, P) 0/1 segment indicator
    segt = segt_ref[...]                   # (P, P*C)
    inv_c = 1.0 / c
    mean = jnp.dot(x, seg, preferred_element_type=jnp.float32, precision=_HP) * inv_c
    mean_b = jnp.dot(mean, segt, preferred_element_type=jnp.float32, precision=_HP)
    xc = x - mean_b                        # centered pass: no cancellation / negative var
    var = jnp.dot(xc * xc, seg, preferred_element_type=jnp.float32, precision=_HP) * inv_c
    inv = jax.lax.rsqrt(var + eps)
    inv_b = jnp.dot(inv, segt, preferred_element_type=jnp.float32, precision=_HP)
    o_ref[...] = (xc * inv_b * w_ref[...] + b_ref[...]).astype(o_ref.dtype)


def _ln_last_kernel(x_ref, w_ref, b_ref, o_ref, *, eps, c):
    # x_ref: (TM, C); normalize each row over the lane (C) axis.
    x = x_ref[...].astype(jnp.float32)
    inv_c = 1.0 / c
    mean = jnp.sum(x, axis=-1, keepdims=True) * inv_c
    xc = x - mean
    var = jnp.sum(xc * xc, axis=-1, keepdims=True) * inv_c
    inv = jax.lax.rsqrt(var + eps)
    o_ref[...] = (xc * inv * w_ref[...] + b_ref[...]).astype(o_ref.dtype)


def _ln_cfirst_kernel(x_ref, w_ref, b_ref, o_ref, *, eps, c):
    # x_ref: (nb, C, T) NCHW tile; normalize over the sublane (C) axis, no transposes.
    x = x_ref[...].astype(jnp.float32)
    inv_c = 1.0 / c
    mean = jnp.sum(x, axis=1, keepdims=True) * inv_c          # (nb, 1, T)
    xc = x - mean
    var = jnp.sum(xc * xc, axis=1, keepdims=True) * inv_c
    inv = jax.lax.rsqrt(var + eps)
    o_ref[...] = (xc * inv * w_ref[...] + b_ref[...]).astype(o_ref.dtype)   # w/b: (1, C, 1)


# -------------------------------- wrappers -----------------------------------


def _layernorm_rows(x2d, weight, bias, eps, vmem_budget_bytes=None):
    """x2d: (rows, C); per-row LayerNorm over C (channels_last semantics)."""
    rows, c = x2d.shape
    itemsize = jnp.dtype(x2d.dtype).itemsize
    budget, limit = _vmem_budget_and_limit()
    if vmem_budget_bytes is not None:
        budget = vmem_budget_bytes
    w32 = weight.astype(jnp.float32)
    b32 = bias.astype(jnp.float32)

    pack = 0
    if 8 <= c < _LANES and c % 8 == 0:
        pack = _LANES // math.gcd(c, _LANES)
        if pack < 2 or pack > _MAX_PACK:
            pack = 0

    if pack:
        # Lane-dense packed path: view (rows, C) as (rows/P, P*C) -- same HBM bytes.
        rows_p = pl.cdiv(rows, pack)
        rows_pad = rows_p * pack
        x_in = x2d
        if rows_pad != rows:
            # Rare odd-shape case: pad so the reshape stays a free metadata reshape.
            # Costs one extra copy but keeps every store unmasked / 128-lane dense.
            x_in = jnp.pad(x2d, ((0, rows_pad - rows), (0, 0)))
        cp = pack * c                                     # multiple of 128 lanes
        x_p = x_in.reshape(rows_p, cp)
        w_p = jnp.tile(w32, pack).reshape(1, cp)          # lane l -> weight[l % C]
        b_p = jnp.tile(b32, pack).reshape(1, cp)
        lane = np.arange(cp)
        seg_np = (lane[:, None] // c == np.arange(pack)[None, :]).astype(np.float32)
        seg = jnp.asarray(seg_np)                         # (cp, pack)
        seg_t = jnp.asarray(np.ascontiguousarray(seg_np.T))   # (pack, cp)

        tm = _row_tile(rows_p, cp * itemsize, cp * _F32, budget)
        grid = (pl.cdiv(rows_p, tm),)
        cost = pl.CostEstimate(
            flops=int((10 + 8 * pack) * rows_p * cp),
            transcendentals=int(rows_pad),
            bytes_accessed=int(2 * rows_p * cp * itemsize),
        )
        kernel = functools.partial(_ln_last_packed_kernel, eps=eps, c=c)
        y_p = pl.pallas_call(
            kernel,
            out_shape=jax.ShapeDtypeStruct((rows_p, cp), x2d.dtype),
            grid_spec=pltpu.PrefetchScalarGridSpec(
                num_scalar_prefetch=0,
                grid=grid,
                in_specs=[
                    pl.BlockSpec((tm, cp), lambda i: (i, 0)),
                    pl.BlockSpec((1, cp), lambda i: (0, 0)),
                    pl.BlockSpec((1, cp), lambda i: (0, 0)),
                    pl.BlockSpec((cp, pack), lambda i: (0, 0)),
                    pl.BlockSpec((pack, cp), lambda i: (0, 0)),
                ],
                out_specs=pl.BlockSpec((tm, cp), lambda i: (i, 0)),
            ),
            compiler_params=_compiler_params(("parallel",), limit),
            cost_estimate=cost,
        )(x_p, w_p, b_p, seg, seg_t)
        y = y_p.reshape(rows_pad, c)
        if rows_pad != rows:
            y = y[:rows]
        return y

    # Generic path (C >= 128, or C not a multiple of 8): block covers the full C axis.
    tm = _row_tile(rows, c * itemsize, c * _F32, budget)
    grid = (pl.cdiv(rows, tm),)
    cost = pl.CostEstimate(
        flops=int(10 * rows * c),
        transcendentals=int(rows),
        bytes_accessed=int(2 * rows * c * itemsize),
    )
    kernel = functools.partial(_ln_last_kernel, eps=eps, c=c)
    return pl.pallas_call(
        kernel,
        out_shape=jax.ShapeDtypeStruct((rows, c), x2d.dtype),
        grid_spec=pltpu.PrefetchScalarGridSpec(
            num_scalar_prefetch=0,
            grid=grid,
            in_specs=[
                pl.BlockSpec((tm, c), lambda i: (i, 0)),
                pl.BlockSpec((1, c), lambda i: (0, 0)),
                pl.BlockSpec((1, c), lambda i: (0, 0)),
            ],
            out_specs=pl.BlockSpec((tm, c), lambda i: (i, 0)),
        ),
        compiler_params=_compiler_params(("parallel",), limit),
        cost_estimate=cost,
    )(x2d, w32.reshape(1, c), b32.reshape(1, c))


def _layernorm_cfirst(x, weight, bias, eps, vmem_budget_bytes=None):
    """x: (B, C, H, W); LayerNorm over the channel axis, natively on NCHW."""
    bsz, c, h, w = x.shape
    hw = h * w
    itemsize = jnp.dtype(x.dtype).itemsize
    budget, limit = _vmem_budget_and_limit()
    if vmem_budget_bytes is not None:
        budget = vmem_budget_bytes
    x3 = x.reshape(bsz, c, hw)                            # contiguous view, no transpose
    w3 = weight.astype(jnp.float32).reshape(1, c, 1)
    b3 = bias.astype(jnp.float32).reshape(1, c, 1)

    nb, t = _cfirst_tiles(bsz, c, hw, itemsize, budget)   # batch images per block for small H*W
    grid = (pl.cdiv(bsz, nb), pl.cdiv(hw, t))
    cost = pl.CostEstimate(
        flops=int(10 * bsz * c * hw),
        transcendentals=int(bsz * hw),
        bytes_accessed=int(2 * bsz * c * hw * itemsize),
    )
    kernel = functools.partial(_ln_cfirst_kernel, eps=eps, c=c)
    y3 = pl.pallas_call(
        kernel,
        out_shape=jax.ShapeDtypeStruct((bsz, c, hw), x.dtype),
        grid_spec=pltpu.PrefetchScalarGridSpec(
            num_scalar_prefetch=0,
            grid=grid,
            in_specs=[
                pl.BlockSpec((nb, c, t), lambda i, j: (i, 0, j)),
                pl.BlockSpec((1, c, 1), lambda i, j: (0, 0, 0)),
                pl.BlockSpec((1, c, 1), lambda i, j: (0, 0, 0)),
            ],
            out_specs=pl.BlockSpec((nb, c, t), lambda i, j: (i, 0, j)),
        ),
        compiler_params=_compiler_params(("parallel", "parallel"), limit),
        cost_estimate=cost,
    )(x3, w3, b3)
    return y3.reshape(bsz, c, h, w)


@functools.partial(jax.jit, static_argnames=("eps", "data_format"))
def layer_norm(x, weight, bias, eps=1e-6, data_format="channels_last"):
    """Forward of the PyTorch LayerNorm module."""
    if data_format not in ("channels_last", "channels_first"):
        raise ValueError(f"not support data format '{data_format}'")
    if data_format == "channels_last":
        c = x.shape[-1]
        lead = x.shape[:-1]
        y2d = _layernorm_rows(x.reshape(-1, c), weight, bias, eps)
        return y2d.reshape(*lead, c)
    return _layernorm_cfirst(x, weight, bias, eps)


# ------------------------------ reference / test ------------------------------


def _ref_channels_last(x, weight, bias, eps):
    xf = x.astype(jnp.float32)
    mean = xf.mean(-1, keepdims=True)
    var = ((xf - mean) ** 2).mean(-1, keepdims=True)
    y = (xf - mean) / jnp.sqrt(var + eps)
    return y * weight + bias


def _ref_channels_first(x, weight, bias, eps):
    xf = x.astype(jnp.float32)
    mean = xf.mean(1, keepdims=True)
    var = ((xf - mean) ** 2).mean(1, keepdims=True)
    y = (xf - mean) / jnp.sqrt(var + eps)
    return weight[:, None, None] * y + bias[:, None, None]


def _check(name, y, ref, atol=1e-5, rtol=1e-5):
    y = jax.block_until_ready(y)
    err = float(jnp.max(jnp.abs(y.astype(jnp.float32) - ref)))
    assert jnp.allclose(y.astype(jnp.float32), ref, atol=atol, rtol=rtol), (
        f"{name}: max_abs_err={err}")


if __name__ == "__main__":
    key = jax.random.PRNGKey(0)
    k = jax.random.split(key, 10)
    eps = 1e-6
    C = 32
    weight = jnp.ones((C,), jnp.float32) + 0.1 * jax.random.normal(k[0], (C,))
    bias = jnp.zeros((C,), jnp.float32) + 0.1 * jax.random.normal(k[1], (C,))

    # 1) channels_last, C=32 -> lane-packed path (pack=4, rows divisible).
    x_last = jax.random.normal(k[2], (2, 8, 8, C), jnp.float32)
    y = layer_norm(x_last, weight, bias, eps=eps, data_format="channels_last")
    _check("channels_last/packed", y, _ref_channels_last(x_last, weight, bias, eps))

    # 2) channels_first, native NCHW kernel, several images batched per block.
    x_first = jax.random.normal(k[3], (2, C, 8, 8), jnp.float32)
    y = layer_norm(x_first, weight, bias, eps=eps, data_format="channels_first")
    _check("channels_first", y, _ref_channels_first(x_first, weight, bias, eps))

    # 3) channels_last, C=48 (pack=8) with rows=50 -> padded packed path.
    C2 = 48
    w2 = jnp.ones((C2,), jnp.float32) + 0.1 * jax.random.normal(k[4], (C2,))
    b2 = jnp.zeros((C2,), jnp.float32) + 0.1 * jax.random.normal(k[5], (C2,))
    x2 = jax.random.normal(k[6], (2, 5, 5, C2), jnp.float32)
    y = layer_norm(x2, w2, b2, eps=eps, data_format="channels_last")
    _check("channels_last/packed_padded", y, _ref_channels_last(x2, w2, b2, eps))

    # 3b) non-zero-mean data (guards the centered-variance fix; looser f32 tolerance).
    x2_off = x2 + 300.0
    y = layer_norm(x2_off, w2, b2, eps=eps, data_format="channels_last")
    _check("channels_last/offset", y, _ref_channels_last(x2_off, w2, b2, eps),
           atol=2e-3, rtol=2e-3)

    # 4) channels_last, C=100 (not a multiple of 8) -> generic lane-sum path.
    C3 = 100
    w3 = jnp.ones((C3,), jnp.float32)
    b3 = jnp.zeros((C3,), jnp.float32)
    x3 = jax.random.normal(k[7], (2, 5, 5, C3), jnp.float32)
    y = layer_norm(x3, w3, b3, eps=eps, data_format="channels_last")
    _check("channels_last/generic", y, _ref_channels_last(x3, w3, b3, eps))

    # 5) bf16 input on the packed path (C=64 -> pack=2).
    C4 = 64
    w4 = jnp.ones((C4,), jnp.float32) + 0.1 * jax.random.normal(k[8], (C4,))
    b4 = jnp.zeros((C4,), jnp.float32)
    x4 = jax.random.normal(k[9], (2, 8, 8, C4), jnp.float32).astype(jnp.bfloat16)
    y = layer_norm(x4, w4, b4, eps=eps, data_format="channels_last")
    _check("channels_last/bf16", y, _ref_channels_last(x4, w4, b4, eps),
           atol=5e-2, rtol=5e-2)

    # 6) Multi-block grids with non-divisible tails (small forced VMEM budgets).
    x_tail = jax.random.normal(k[2], (144, C), jnp.float32)       # rows_p=36, tm=8 -> tail 4
    y = _layernorm_rows(x_tail, weight, bias, eps,
                        vmem_budget_bytes=8 * (4 * 128 * 4 + 6 * 128 * 4))
    _check("channels_last/packed_tail", y, _ref_channels_last(x_tail, weight, bias, eps))

    x_tail2 = jax.random.normal(k[3], (50, C3), jnp.float32)      # tm=8 -> tail 2
    y = _layernorm_rows(x_tail2, w3, b3, eps,
                        vmem_budget_bytes=8 * (4 * C3 * 4 + 6 * C3 * 4))
    _check("channels_last/generic_tail", y, _ref_channels_last(x_tail2, w3, b3, eps))

    x_cf = jax.random.normal(k[4], (1, C, 16, 40), jnp.float32)   # hw=640 -> t=256, tail 128
    y = _layernorm_cfirst(x_cf, weight, bias, eps,
                          vmem_budget_bytes=256 * C * (4 * 4 + 6 * 4))
    _check("channels_first/hw_tail", y, _ref_channels_first(x_cf, weight, bias, eps))

    x_cf2 = jax.random.normal(k[5], (5, C, 4, 4), jnp.float32)    # nb=2 -> batch grid 3 + tail
    y = _layernorm_cfirst(x_cf2, weight, bias, eps,
                          vmem_budget_bytes=2 * C * 16 * (4 * 4 + 6 * 4))
    _check("channels_first/batch_tail", y, _ref_channels_first(x_cf2, weight, bias, eps))

    print("KERNEL_OK")
</pallas_src>

<mosaic_0001>
module attributes {stable_mosaic.version = 11 : i64} {
  func.func @_ln_last_packed_kernel(%arg0: i32, %arg1: memref<32x128xf32, #tpu.memory_space<vmem>>, %arg2: memref<1x128xf32, #tpu.memory_space<vmem>>, %arg3: memref<1x128xf32, #tpu.memory_space<vmem>>, %arg4: memref<128x4xf32, #tpu.memory_space<vmem>>, %arg5: memref<4x128xf32, #tpu.memory_space<vmem>>, %arg6: memref<32x128xf32, #tpu.memory_space<vmem>>) attributes {dimension_semantics = [#tpu.dimension_semantics<parallel>], iteration_bounds = array<i64: 1>, scalar_prefetch = 0 : i64, scratch_operands = 0 : i64, tpu.core_type = #tpu.core_type<tc>, window_params = [{transform_indices = @transform_0, window_bounds = array<i64: 32, 128>}, {pipeline_mode = #tpu.pipeline_mode<synchronous>, transform_indices = @transform_1, window_bounds = array<i64: 1, 128>}, {pipeline_mode = #tpu.pipeline_mode<synchronous>, transform_indices = @transform_2, window_bounds = array<i64: 1, 128>}, {pipeline_mode = #tpu.pipeline_mode<synchronous>, transform_indices = @transform_3, window_bounds = array<i64: 128, 4>}, {pipeline_mode = #tpu.pipeline_mode<synchronous>, transform_indices = @transform_4, window_bounds = array<i64: 4, 128>}, {transform_indices = @transform_5, window_bounds = array<i64: 32, 128>}]} {
    %c0 = arith.constant 0 : index
    %c0_0 = arith.constant 0 : index
    %0 = vector.load %arg1[%c0, %c0_0] : memref<32x128xf32, #tpu.memory_space<vmem>>, vector<32x128xf32>
    %c0_1 = arith.constant 0 : index
    %c0_2 = arith.constant 0 : index
    %1 = vector.load %arg4[%c0_1, %c0_2] : memref<128x4xf32, #tpu.memory_space<vmem>>, vector<128x4xf32>
    %c0_3 = arith.constant 0 : index
    %c0_4 = arith.constant 0 : index
    %2 = vector.load %arg5[%c0_3, %c0_4] : memref<4x128xf32, #tpu.memory_space<vmem>>, vector<4x128xf32>
    %cst = arith.constant dense<0.000000e+00> : vector<32x4xf32>
    %3 = tpu.matmul %0, %1, %cst {dimension_numbers = #tpu.dot_dimension_numbers<[1], [0], [0], [1], [0, 0, 1, 1], [], []>, precision = #tpu.contract_precision<fp32>} : vector<32x128xf32>, vector<128x4xf32>, vector<32x4xf32> -> vector<32x4xf32>
    %cst_5 = arith.constant 3.125000e-02 : f32
    %4 = vector.broadcast %cst_5 : f32 to vector<32x4xf32>
    %5 = arith.mulf %3, %4 : vector<32x4xf32>
    %cst_6 = arith.constant dense<0.000000e+00> : vector<32x128xf32>
    %6 = tpu.matmul %5, %2, %cst_6 {dimension_numbers = #tpu.dot_dimension_numbers<[1], [0], [0], [1], [0, 0, 1, 1], [], []>, precision = #tpu.contract_precision<fp32>} : vector<32x4xf32>, vector<4x128xf32>, vector<32x128xf32> -> vector<32x128xf32>
    %7 = arith.subf %0, %6 : vector<32x128xf32>
    %8 = arith.mulf %7, %7 : vector<32x128xf32>
    %cst_7 = arith.constant dense<0.000000e+00> : vector<32x4xf32>
    %9 = tpu.matmul %8, %1, %cst_7 {dimension_numbers = #tpu.dot_dimension_numbers<[1], [0], [0], [1], [0, 0, 1, 1], [], []>, precision = #tpu.contract_precision<fp32>} : vector<32x128xf32>, vector<128x4xf32>, vector<32x4xf32> -> vector<32x4xf32>
    %cst_8 = arith.constant 3.125000e-02 : f32
    %10 = vector.broadcast %cst_8 : f32 to vector<32x4xf32>
    %11 = arith.mulf %9, %10 : vector<32x4xf32>
    %cst_9 = arith.constant 9.99999997E-7 : f32
    %12 = vector.broadcast %cst_9 : f32 to vector<32x4xf32>
    %13 = arith.addf %11, %12 : vector<32x4xf32>
    %14 = math.rsqrt %13 : vector<32x4xf32>
    %cst_10 = arith.constant dense<0.000000e+00> : vector<32x128xf32>
    %15 = tpu.matmul %14, %2, %cst_10 {dimension_numbers = #tpu.dot_dimension_numbers<[1], [0], [0], [1], [0, 0, 1, 1], [], []>, precision = #tpu.contract_precision<fp32>} : vector<32x4xf32>, vector<4x128xf32>, vector<32x128xf32> -> vector<32x128xf32>
    %16 = arith.mulf %7, %15 : vector<32x128xf32>
    %c0_11 = arith.constant 0 : index
    %c0_12 = arith.constant 0 : index
    %17 = vector.load %arg2[%c0_11, %c0_12] : memref<1x128xf32, #tpu.memory_space<vmem>>, vector<1x128xf32>
    %18 = vector.broadcast %17 : vector<1x128xf32> to vector<32x128xf32>
    %19 = arith.mulf %16, %18 : vector<32x128xf32>
    %c0_13 = arith.constant 0 : index
    %c0_14 = arith.constant 0 : index
    %20 = vector.load %arg3[%c0_13, %c0_14] : memref<1x128xf32, #tpu.memory_space<vmem>>, vector<1x128xf32>
    %21 = vector.broadcast %20 : vector<1x128xf32> to vector<32x128xf32>
    %22 = arith.addf %19, %21 : vector<32x128xf32>
    %c0_15 = arith.constant 0 : index
    %c0_16 = arith.constant 0 : index
    %23 = vector.load %arg6[%c0_15, %c0_16] : memref<32x128xf32, #tpu.memory_space<vmem>>, vector<32x128xf32>
    tpu.vector_store %arg6[%c0_15, %c0_16], %22 {strides = array<i32>} : memref<32x128xf32, #tpu.memory_space<vmem>>, vector<32x128xf32>,
    return
  }
  func.func @transform_0(%arg0: i32) -> (i32, i32) {
    %c0_i32 = arith.constant 0 : i32
    %c0_i32_0 = arith.constant 0 : i32
    return %arg0, %c0_i32 : i32, i32
  }
  func.func @transform_1(%arg0: i32) -> (i32, i32) {
    %c0_i32 = arith.constant 0 : i32
    %c0_i32_0 = arith.constant 0 : i32
    %c0_i32_1 = arith.constant 0 : i32
    return %c0_i32, %c0_i32_0 : i32, i32
  }
  func.func @transform_2(%arg0: i32) -> (i32, i32) {
    %c0_i32 = arith.constant 0 : i32
    %c0_i32_0 = arith.constant 0 : i32
    %c0_i32_1 = arith.constant 0 : i32
    return %c0_i32, %c0_i32_0 : i32, i32
  }
  func.func @transform_3(%arg0: i32) -> (i32, i32) {
    %c0_i32 = arith.constant 0 : i32
    %c0_i32_0 = arith.constant 0 : i32
    %c0_i32_1 = arith.constant 0 : i32
    return %c0_i32, %c0_i32_0 : i32, i32
  }
  func.func @transform_4(%arg0: i32) -> (i32, i32) {
    %c0_i32 = arith.constant 0 : i32
    %c0_i32_0 = arith.constant 0 : i32
    %c0_i32_1 = arith.constant 0 : i32
    return %c0_i32, %c0_i32_0 : i32, i32
  }
  func.func @transform_5(%arg0: i32) -> (i32, i32) {
    %c0_i32 = arith.constant 0 : i32
    %c0_i32_0 = arith.constant 0 : i32
    return %arg0, %c0_i32 : i32, i32
  }
}

</mosaic_0001>

<bundles_post_ra>
// kernel: tile.14
= control target key start
LH: loop header
LB: loop body
LE: loop exit
PB: predicated region body
PF: predicated region fallthrough
CT: control target
= control target key end

     0   :  { %vm8_vm0 = vcmask 261120   ;;  %s40_s8 = smov 32   ;;  %s41_s9 = smov 64   ;;  %vm14_vm1 = vcmask 1048320   ;;  %vm20_vm2 = vcmask 785920   ;;  %vm26_vm3 = vcmask 523520   ;;  %s58_s0 = inlined_call_operand.vmem [shape: f32[4,32], index: 0, kind: input, shape index: {}]   ;;  %s59_s1 = inlined_call_operand.vmem [shape: f32[1,128], index: 1, kind: output, shape index: {}]  }
   0x1   :  { %v5_v0 = vld [vmem:[%s58_s0] sm:$0xf]  ;;  %s39_s0 = smov 96  }
   0x2   :  { %6 = vst [vmem:[#allocation1] sm:$0xf] %v5_v0 }
   0x9   :  { %v11_v1 = vld [vmem:[#allocation1 + $0x3] sm:$0x1]   ;;  %v23_v2 = vld [vmem:[#allocation1 + $0x1] sm:$0x1]   ;;  %v7_v3 = vld [vmem:[#allocation1] sm:$0x1]  }
   0xa   :  { %12 = vrot.lane.b32.xlu0 %v11_v1, %s39_s0  ;;  %24 = vrot.lane.b32.xlu1 %v23_v2, %s40_s8  ;;  %v17_v4 = vld [vmem:[#allocation1 + $0x2] sm:$0x1]   ;;  %9 = vst.msk [vmem:[#allocation0] sm:$0x1] %vm8_vm0, %v7_v3  }
   0xe   :  { %18 = vrot.lane.b32.xlu0 %v17_v4, %s41_s9 }
  0x7c   :  { %v13_v5 = vpop.permute.xlu0 %12   ;;  %v25_v6 = vpop.permute.xlu1 %24  }
  0x7d   :  { %15 = vst.msk [vmem:[#allocation0] sm:$0x1] %vm14_vm1, %v13_v5  }
  0x80   :  { %v19_v7 = vpop.permute.xlu0 %18  }
  0x81   :  { %21 = vst.msk [vmem:[#allocation0] sm:$0x1] %vm20_vm2, %v19_v7  }
  0x82   :  { %27 = vst.msk [vmem:[#allocation0] sm:$0x1] %vm26_vm3, %v25_v6  }
  0x89   :  { %v32_v8 = vld [vmem:[#allocation0] sm:$0x1] }
  0x8a   :  { %35 = vst [vmem:[%s59_s1] sm:$0x1] %v32_v8 }

// kernel: tile.13
= control target key start
LH: loop header
LB: loop body
LE: loop exit
PB: predicated region body
PF: predicated region fallthrough
CT: control target
= control target key end

     0   :  { %2 = vsyncpa [#allocation1], 0  ;;  %s42_s6 = smov [#allocation0]   ;;  %s59_s0 = inlined_call_operand.hbm [shape: f32[32], index: 0, kind: input, shape index: {}]   ;;  %s60_s1 = inlined_call_operand.vmem [shape: f32[4,32], index: 1, kind: output, shape index: {}]  }
   0x1   :  { %s9_s7 = sshll.u32 %s42_s6, 4  ;;  %s10_s7 = int_to_ptr.vmem [resolvable:$true] %s9_s7 }
   0x2   :  { %s28_s8 = scalar_lea.vmem %s10_s7, 16  ;;  %s32_s9 = scalar_lea.vmem %s10_s7, 32 }
   0x3   :  { %p29_p0 = scmp.ne.s32.totalorder %s10_s7, %s28_s8  ;;  %p33_p1 = scmp.lt.s32.totalorder %s10_s7, %s10_s7 }
   0x4   :  { %p34_p2 = scmp.lt.s32.totalorder %s32_s9, %s28_s8 }
   0x6   :  { %p35_p3 = por %p34_p2, %p33_p1 }
   0x8   :  { %p36_p4 = pnand %p35_p3, %p29_p0 }
   0xa   :  { %39 = shalt.err (!%p36_p4)
}
   0xb   :  { %12 = dma.hbm_to_vmem [thread:$0]  %s59_s0, 16, %s10_s7, [#allocation1]  }
   0xc   :  { %40 = dma.done.wait [#allocation1], 16  }
   0xd   :  { %41 = vsyncadd [#allocation1], 4294967280  ;;  %v16_v0 = vld [vmem:[#allocation0] ss:$0 sm:$0xff] }
   0xe   :  { %17 = vst [vmem:[%s60_s1] sm:$0xf] %v16_v0 }
   0xf   :  { %18 = vsyncpa [#allocation1], 1 }

// kernel: layer_norm.1
= control target key start
LH: loop header
LB: loop body
LE: loop exit
PB: predicated region body
PF: predicated region fallthrough
CT: control target
= control target key end

     0   :  { %vm828_vm0 = vcmask 1043456   ;;  %vm815_vm1 = vcmask 31744   ;;  %s4562_s3 = inlined_call_operand.vmem [shape: f32[128,4], index: 3, kind: input, shape index: {}]   ;;  %s4563_s0 = inlined_call_operand.vmem [shape: f32[32,128], index: 0, kind: input, shape index: {}]   ;;  %s4564_s4 = inlined_call_operand.vmem [shape: f32[4,128], index: 4, kind: input, shape index: {}]   ;;  %s4565_s1 = inlined_call_operand.vmem [shape: f32[1,128], index: 1, kind: input, shape index: {}]   ;;  %s4566_s2 = inlined_call_operand.vmem [shape: f32[1,128], index: 2, kind: input, shape index: {}]   ;;  %s4567_s5 = inlined_call_operand.vmem [shape: f32[32,128], index: 5, kind: output, shape index: {}]  }
   0x1   :  { %v39_v0 = vld [vmem:[%s4562_s3 + $0x78] sm:$0xff]  ;;  %v38_v1 = vld [vmem:[%s4562_s3 + $0x70] sm:$0xff]  ;;  %v37_v2 = vld [vmem:[%s4562_s3 + $0x68] sm:$0xff] }
   0x2   :  { %v3719_v3 = vand.u32 4294901760, %v39_v0  ;;  %v3721_v4 = vand.u32 4294901760, %v38_v1  ;;  %v3723_v5 = vand.u32 4294901760, %v37_v2  ;;  %v36_v6 = vld [vmem:[%s4562_s3 + $0x60] sm:$0xff]  ;;  %v35_v7 = vld [vmem:[%s4562_s3 + $0x58] sm:$0xff]  ;;  %v34_v8 = vld [vmem:[%s4562_s3 + $0x50] sm:$0xff] }
   0x3   :  { %v3734_v9 = vand.u32 4294901760, %v36_v6  ;;  %v3736_v10 = vand.u32 4294901760, %v35_v7  ;;  %v3738_v11 = vand.u32 4294901760, %v34_v8  ;;  %v33_v12 = vld [vmem:[%s4562_s3 + $0x48] sm:$0xff]  ;;  %v32_v13 = vld [vmem:[%s4562_s3 + $0x40] sm:$0xff]  ;;  %v31_v18 = vld [vmem:[%s4562_s3 + $0x38] sm:$0xff] }
   0x4   :  { %3120 = vmatprep.subr.mxu0 %v3719_v3  ;;  %v3748_v14 = vsub.f32 %v39_v0, %v3719_v3  ;;  %v3751_v15 = vsub.f32 %v38_v1, %v3721_v4  ;;  %v3753_v16 = vand.u32 4294901760, %v33_v12  ;;  %v3756_v17 = vsub.f32 %v37_v2, %v3723_v5  ;;  %v30_v25 = vld [vmem:[%s4562_s3 + $0x30] sm:$0xff]  ;;  %v29_v35 = vld [vmem:[%s4562_s3 + $0x28] sm:$0xff]  ;;  %v28_v40 = vld [vmem:[%s4562_s3 + $0x20] sm:$0xff] }
   0x5   :  { %3121 = vmatpush3.msra.mxu0 %v3719_v3  ;;  %v3763_v19 = vsub.f32 %v36_v6, %v3734_v9  ;;  %v3766_v20 = vsub.f32 %v35_v7, %v3736_v10  ;;  %v3778_v24 = vand.u32 4294901760, %v32_v13  ;;  %v3787_v27 = vand.u32 4294901760, %v31_v18  ;;  %v27_v48 = vld [vmem:[%s4562_s3 + $0x18] sm:$0xff]  ;;  %v3852_v49 = vld [vmem:[%s4563_s0] sm:$0xff]  ;;  %v3869_v54 = vld [vmem:[%s4563_s0 + $0x8] sm:$0xff] }
   0x6   :  { %4653 = vst [vmem:[#allocation2_spill] sm:$0xff] %v3751_v15  ;;  %4654 = vst [vmem:[#allocation3_spill] sm:$0xff] %v3756_v17  ;;  %3122 = vmatprep.subr.mxu0 %v3721_v4  ;;  %v3770_v21 = vand.u32 4294901760, %v3748_v14  ;;  %v3773_v22 = vand.u32 4294901760, %v3751_v15  ;;  %v3776_v23 = vand.u32 4294901760, %v3756_v17  ;;  %v3793_v29 = vsub.f32 %v34_v8, %v3738_v11  ;;  %v26_v59 = vld [vmem:[%s4562_s3 + $0x10] sm:$0xff] }
   0x7   :  { %4655 = vst [vmem:[#allocation4_spill] sm:$0xff] %v3763_v19  ;;  %4656 = vst [vmem:[#allocation5_spill] sm:$0xff] %v3766_v20  ;;  %3123 = vmatpush3.msra.mxu0 %v3721_v4  ;;  %v3785_v26 = vand.u32 4294901760, %v3763_v19  ;;  %v3790_v28 = vand.u32 4294901760, %v3766_v20  ;;  %v3803_v33 = vsub.f32 %v33_v12, %v3753_v16  ;;  %v3806_v34 = vand.u32 4294901760, %v30_v25  ;;  %v25_v2 = vld [vmem:[%s4562_s3 + $0x8] sm:$0xff] }
   0x8   :  { %4657 = vst [vmem:[#allocation6_spill] sm:$0xff] %v3770_v21  ;;  %4658 = vst [vmem:[#allocation7_spill] sm:$0xff] %v3773_v22  ;;  %3124 = vmatprep.subr.mxu0 %v3723_v5  ;;  %v166_v30 = vsub.f32 %v3748_v14, %v3770_v21  ;;  %v173_v31 = vsub.f32 %v3751_v15, %v3773_v22  ;;  %v180_v32 = vsub.f32 %v3756_v17, %v3776_v23 }
   0x9   :  { %4659 = vst [vmem:[#allocation8_spill] sm:$0xff] %v3776_v23  ;;  %4660 = vst [vmem:[#allocation9_spill] sm:$0xff] %v3785_v26  ;;  %3125 = vmatpush3.msra.mxu0 %v3723_v5  ;;  %v187_v38 = vsub.f32 %v3763_v19, %v3785_v26  ;;  %v3819_v39 = vand.u32 4294901760, %v3793_v29  ;;  %v194_v41 = vsub.f32 %v3766_v20, %v3790_v28  ;;  %v3828_v42 = vand.u32 4294901760, %v3803_v33 }
   0xa   :  { %4661 = vst [vmem:[#allocation10_spill] sm:$0xff] %v3790_v28  ;;  %4662 = vst [vmem:[#allocation11_spill] sm:$0xff] %v3793_v29  ;;  %3126 = vmatprep.subr.mxu0 %v3734_v9  ;;  %v3812_v36 = vand.u32 4294901760, %v166_v30  ;;  %v3814_v37 = vand.u32 4294901760, %v173_v31  ;;  %v3831_v43 = vsub.f32 %v32_v13, %v3778_v24  ;;  %v3835_v44 = vand.u32 4294901760, %v180_v32 }
   0xb   :  { %4663 = vst [vmem:[#allocation12_spill] sm:$0xff] %v3803_v33  ;;  %4665 = vst [vmem:[#allocation14_spill] sm:$0xff] %v3819_v39  ;;  %3127 = vmatpush3.msra.mxu0 %v3734_v9  ;;  %v3837_v45 = vand.u32 4294901760, %v29_v35  ;;  %v3840_v46 = vsub.f32 %v31_v18, %v3787_v27  ;;  %v3844_v47 = vand.u32 4294901760, %v28_v40  ;;  %v3856_v50 = vand.u32 4294901760, %v187_v38  ;;  %v24_v18 = vld [vmem:[%s4562_s3] sm:$0xff] }
   0xc   :  { %4664 = vst [vmem:[#allocation13_spill] sm:$0xff] %v3814_v37  ;;  %4666 = vst [vmem:[#allocation15_spill] sm:$0xff] %v3828_v42  ;;  %3128 = vmatprep.subr.mxu0 %v3736_v10  ;;  %3158 = vmatprep.subr.mxu1 %v3812_v36  ;;  %v201_v51 = vsub.f32 %v3793_v29, %v3819_v39  ;;  %v3861_v52 = vand.u32 4294901760, %v3831_v43  ;;  %v3864_v53 = vsub.f32 %v30_v25, %v3806_v34 }
   0xd   :  { %4667 = vst [vmem:[#allocation16_spill] sm:$0xff] %v3831_v43  ;;  %4668 = vst [vmem:[#allocation17_spill] sm:$0xff] %v3835_v44  ;;  %3129 = vmatpush3.msra.mxu0 %v3736_v10  ;;  %3159 = vmatpush3.msra.mxu1 %v3812_v36  ;;  %v3873_v55 = vand.u32 4294901760, %v194_v41  ;;  %v208_v56 = vsub.f32 %v3803_v33, %v3828_v42  ;;  %v3879_v57 = vand.u32 4294901760, %v27_v48  ;;  %v3882_v58 = vand.u32 4294901760, %v3840_v46 }
   0xe   :  { %4669 = vst [vmem:[#allocation18_spill] sm:$0xff] %v3840_v46  ;;  %4670 = vst [vmem:[#allocation19_spill] sm:$0xff] %v3852_v49  ;;  %3130 = vmatprep.subr.mxu0 %v3738_v11  ;;  %3160 = vmatprep.subr.mxu1 %v3814_v37  ;;  %v3888_v60 = vsub.f32 %v29_v35, %v3837_v45  ;;  %v3891_v61 = vand.u32 4294901760, %v3852_v49  ;;  %v3896_v62 = vand.u32 4294901760, %v3869_v54  ;;  %v3900_v63 = vand.u32 4294901760, %v201_v51 }
   0xf   :  { %4671 = vst [vmem:[#allocation20_spill] sm:$0xff] %v3856_v50  ;;  %4672 = vst [vmem:[#allocation21_spill] sm:$0xff] %v3861_v52  ;;  %3131 = vmatpush3.msra.mxu0 %v3738_v11  ;;  %3161 = vmatpush3.msra.mxu1 %v3814_v37  ;;  %v215_v0 = vsub.f32 %v3831_v43, %v3861_v52  ;;  %v3905_v1 = vand.u32 4294901760, %v3864_v53  ;;  %v3911_v6 = vsub.f32 %v28_v40, %v3844_v47 }
  0x10   :  { %4673 = vst [vmem:[#allocation22_spill] sm:$0xff] %v3864_v53  ;;  %4674 = vst [vmem:[#allocation23_spill] sm:$0xff] %v3869_v54  ;;  %3132 = vmatprep.subr.mxu0 %v3753_v16  ;;  %3162 = vmatprep.subr.mxu1 %v3835_v44  ;;  %v3915_v7 = vand.u32 4294901760, %v208_v56  ;;  %v3917_v8 = vand.u32 4294901760, %v26_v59  ;;  %v222_v12 = vsub.f32 %v3840_v46, %v3882_v58  ;;  %v3924_v13 = vand.u32 4294901760, %v3888_v60 }
  0x11   :  { %4675 = vst [vmem:[#allocation24_spill] sm:$0xff] %v3873_v55  ;;  %4676 = vst [vmem:[#allocation25_spill] sm:$0xff] %v3882_v58  ;;  %3133 = vmatpush3.msra.mxu0 %v3753_v16  ;;  %3163 = vmatpush3.msra.mxu1 %v3835_v44  ;;  %v3931_v25 = vsub.f32 %v3852_v49, %v3891_v61  ;;  %v3934_v30 = vsub.f32 %v27_v48, %v3879_v57  ;;  %v3938_v31 = vand.u32 4294901760, %v25_v2 }
  0x12   :  { %4677 = vst [vmem:[#allocation26_spill] sm:$0xff] %v3888_v60  ;;  %3134 = vmatprep.subr.mxu0 %v3778_v24  ;;  %3164 = vmatprep.subr.mxu1 %v3856_v50  ;;  %4678 = vst [vmem:[#allocation27_spill] sm:$0xff] %v3900_v63  ;;  %v3942_v32 = vsub.f32 %v3869_v54, %v3896_v62  ;;  %v3946_v35 = vand.u32 4294901760, %v215_v0  ;;  %v229_v38 = vsub.f32 %v3864_v53, %v3905_v1 }
  0x13   :  { %4679 = vst [vmem:[#allocation28_spill] sm:$0xff] %v3905_v1  ;;  %4680 = vst [vmem:[#allocation29_spill] sm:$0xff] %v3911_v6  ;;  %3135 = vmatpush3.msra.mxu0 %v3778_v24  ;;  %3165 = vmatpush3.msra.mxu1 %v3856_v50  ;;  %v3951_v40 = vand.u32 4294901760, %v3911_v6  ;;  %v3955_v41 = vand.u32 4294901760, %v24_v18  ;;  %v3958_v48 = vsub.f32 %v26_v59, %v3917_v8  ;;  %v3962_v51 = vand.u32 4294901760, %v222_v12 }
  0x14   :  { %4681 = vst [vmem:[#allocation30_spill] sm:$0xff] %v3915_v7  ;;  %3136 = vmatprep.subr.mxu0 %v3787_v27  ;;  %3166 = vmatprep.subr.mxu1 %v3873_v55  ;;  %4682 = vst [vmem:[#allocation31_spill] sm:$0xff] %v3924_v13  ;;  %v236_v56 = vsub.f32 %v3888_v60, %v3924_v13  ;;  %v3968_v49 = vand.u32 4294901760, %v3934_v30  ;;  %v3974_v54 = vsub.f32 %v25_v2, %v3938_v31 }
  0x15   :  { %4683 = vst [vmem:[#allocation32_spill] sm:$0xff] %v3934_v30  ;;  %3137 = vmatpush3.msra.mxu0 %v3787_v27  ;;  %3167 = vmatpush3.msra.mxu1 %v3873_v55  ;;  %4684 = vst [vmem:[#allocation33_spill] sm:$0xff] %v3946_v35  ;;  %v3978_v12 = vand.u32 4294901760, %v229_v38  ;;  %v243_v0 = vsub.f32 %v3911_v6, %v3951_v40  ;;  %v3988_v59 = vsub.f32 %v24_v18, %v3955_v41 }
  0x16   :  { %3138 = vmatprep.subr.mxu0 %v3806_v34  ;;  %3168 = vmatprep.subr.mxu1 %v3900_v63  ;;  %4685 = vst [vmem:[#allocation34_spill] sm:$0xff] %v3951_v40  ;;  %4686 = vst [vmem:[#allocation35_spill] sm:$0xff] %v3958_v48  ;;  %v3992_v2 = vand.u32 4294901760, %v236_v56  ;;  %v4693_v38 = vand.u32 4294901760, %v3931_v25  ;;  %v250_v55 = vsub.f32 %v3934_v30, %v3968_v49  ;;  %v4694_v18 = vand.u32 4294901760, %v3942_v32 }
  0x17   :  { %3139 = vmatpush3.msra.mxu0 %v3806_v34  ;;  %3169 = vmatpush3.msra.mxu1 %v3900_v63  ;;  %4687 = vst [vmem:[#allocation36_spill] sm:$0xff] %v3962_v51  ;;  %4688 = vst [vmem:[#allocation37_spill] sm:$0xff] %v3968_v49  ;;  %v4005_v50 = vand.u32 4294901760, %v3974_v54  ;;  %v4009_v56 = vand.u32 4294901760, %v243_v0 }
  0x18   :  { %3140 = vmatprep.subr.mxu0 %v3837_v45  ;;  %3170 = vmatprep.subr.mxu1 %v3915_v7  ;;  %4689 = vst [vmem:[#allocation38_spill] sm:$0xff] %v3974_v54  ;;  %4690 = vst [vmem:[#allocation39_spill] sm:$0xff] %v3978_v12  ;;  %v125_v63 = vsub.f32 %v3931_v25, %v4693_v38  ;;  %v4020_v44 = vand.u32 4294901760, %v250_v55 }
  0x19   :  { %3141 = vmatpush3.msra.mxu0 %v3837_v45  ;;  %3171 = vmatpush3.msra.mxu1 %v3915_v7  ;;  %v3985_v7 = vand.u32 4294901760, %v3958_v48  ;;  %4692 = vst [vmem:[#allocation41_spill] sm:$0xff] %v3988_v59  ;;  %4695 = vst [vmem:[#allocation42_spill] sm:$0xff] %v4005_v50 }
  0x1a   :  { %3142 = vmatprep.subr.mxu0 %v3844_v47  ;;  %3172 = vmatprep.subr.mxu1 %v3946_v35 }
  0x1b   :  { %3143 = vmatpush3.msra.mxu0 %v3844_v47  ;;  %3173 = vmatpush3.msra.mxu1 %v3946_v35  ;;  %4691 = vst [vmem:[#allocation40_spill] sm:$0xff] %v3985_v7  ;;  %v135_v35 = vsub.f32 %v3942_v32, %v4694_v18  ;;  %v257_v38 = vsub.f32 %v3958_v48, %v3985_v7  ;;  %v126_v18 = vand.u32 4294901760, %v125_v63 }
  0x1c   :  { %3144 = vmatprep.subr.mxu0 %v3879_v57  ;;  %3174 = vmatprep.subr.mxu1 %v3962_v51 }
  0x1d   :  { %3145 = vmatpush3.msra.mxu0 %v3879_v57  ;;  %3175 = vmatpush3.msra.mxu1 %v3962_v51  ;;  %v4016_v51 = vand.u32 4294901760, %v3988_v59  ;;  %v136_v0 = vand.u32 4294901760, %v135_v35  ;;  %v4030_v37 = vand.u32 4294901760, %v257_v38  ;;  %v4060_v38 = vld [vmem:[%s4563_s0 + $0x18] sm:$0xff] }
  0x1e   :  { %3146 = vmatprep.subr.mxu0 %v3917_v8  ;;  %3176 = vmatprep.subr.mxu1 %v3978_v12 }
  0x1f   :  { %3147 = vmatpush3.msra.mxu0 %v3917_v8  ;;  %3177 = vmatpush3.msra.mxu1 %v3978_v12  ;;  %4696 = vst [vmem:[#allocation43_spill] sm:$0xff] %v4016_v51  ;;  %v264_v12 = vsub.f32 %v3974_v54, %v4005_v50  ;;  %v271_v55 = vsub.f32 %v3988_v59, %v4016_v51 }
  0x20   :  { %3148 = vmatprep.subr.mxu0 %v3938_v31  ;;  %3178 = vmatprep.subr.mxu1 %v3992_v2 }
  0x21   :  { %3149 = vmatpush3.msra.mxu0 %v3938_v31  ;;  %3179 = vmatpush3.msra.mxu1 %v3992_v2  ;;  %v4036_v63 = vand.u32 4294901760, %v264_v12  ;;  %v4042_v35 = vand.u32 4294901760, %v271_v55  ;;  %v4053_v12 = vld [vmem:[%s4563_s0 + $0x10] sm:$0xff] }
  0x22   :  { %3150 = vmatprep.subr.mxu0 %v3955_v41  ;;  %3180 = vmatprep.subr.mxu1 %v4009_v56 }
  0x23   :  { %3151 = vmatpush3.msra.mxu0 %v3955_v41  ;;  %3181 = vmatpush3.msra.mxu1 %v4009_v56 }
  0x24   :  { %3152 = vmatprep.mubr.f32.mxu0 %v126_v18  ;;  %3182 = vmatprep.subr.mxu1 %v4020_v44  ;;  %v4067_v18 = vand.u32 4294901760, %v4053_v12 }
  0x25   :  { %3196 = vmatprep.subr.mxu0 %v3748_v14  ;;  %3153 = vmatmul.mubr.f32.vlgmr.msra.gmra.mxu0 %v136_v0  ;;  %v4072_v0 = vand.u32 4294901760, %v4060_v38 }
  0x26   :  { %3183 = vmatpush3.msra.mxu1 %v4020_v44  ;;  %3197 = vmatpush3.msra.mxu0 %v3748_v14  ;;  %v4082_v55 = vsub.f32 %v4053_v12, %v4067_v18 }
  0x27   :  { %3184 = vmatprep.subr.mxu1 %v4030_v37  ;;  %3198 = vmatprep.subr.mxu0 %v3751_v15 }
  0x28   :  { %3185 = vmatpush3.msra.mxu1 %v4030_v37  ;;  %3199 = vmatpush3.msra.mxu0 %v3751_v15 }
  0x29   :  { %3186 = vmatprep.subr.mxu1 %v4036_v63  ;;  %3200 = vmatprep.subr.mxu0 %v3756_v17 }
  0x2a   :  { %3187 = vmatpush3.msra.mxu1 %v4036_v63  ;;  %3201 = vmatpush3.msra.mxu0 %v3756_v17 }
  0x2b   :  { %3188 = vmatprep.subr.mxu1 %v4042_v35  ;;  %3202 = vmatprep.subr.mxu0 %v3763_v19 }
  0x2c   :  { %3189 = vmatpush3.msra.mxu1 %v4042_v35  ;;  %3190 = vmatprep.mubr.f32.mxu1 %v3891_v61 }
  0x2d   :  { %3203 = vmatpush3.msra.mxu0 %v3763_v19  ;;  %3191 = vmatmul.mubr.f32.vlgmr.msra.gmra.mxu1 %v3896_v62 }
  0x2e   :  { %3204 = vmatprep.subr.mxu0 %v3766_v20  ;;  %3234 = vmatprep.subr.mxu1 %v3719_v3 }
  0x2f   :  { %3205 = vmatpush3.msra.mxu0 %v3766_v20  ;;  %3235 = vmatpush3.msra.mxu1 %v3719_v3  ;;  %v4088_v20 = vsub.f32 %v4060_v38, %v4072_v0 }
  0x30   :  { %3206 = vmatprep.subr.mxu0 %v3793_v29  ;;  %3236 = vmatprep.subr.mxu1 %v3721_v4 }
  0x31   :  { %3207 = vmatpush3.msra.mxu0 %v3793_v29  ;;  %3237 = vmatpush3.msra.mxu1 %v3721_v4  ;;  %v4598_v29 = vand.u32 4294901760, %v4082_v55  ;;  %v154_v19 = vand.u32 4294901760, %v4088_v20 }
  0x32   :  { %3208 = vmatprep.subr.mxu0 %v3803_v33  ;;  %3238 = vmatprep.subr.mxu1 %v3723_v5 }
  0x33   :  { %3209 = vmatpush3.msra.mxu0 %v3803_v33  ;;  %3239 = vmatpush3.msra.mxu1 %v3723_v5 }
  0x34   :  { %3210 = vmatprep.subr.mxu0 %v3831_v43  ;;  %3240 = vmatprep.subr.mxu1 %v3734_v9 }
  0x35   :  { %3211 = vmatpush3.msra.mxu0 %v3831_v43  ;;  %3241 = vmatpush3.msra.mxu1 %v3734_v9  ;;  %v145_v43 = vsub.f32 %v4082_v55, %v4598_v29 }
  0x36   :  { %3212 = vmatprep.subr.mxu0 %v3840_v46  ;;  %3242 = vmatprep.subr.mxu1 %v3736_v10 }
  0x37   :  { %3213 = vmatpush3.msra.mxu0 %v3840_v46  ;;  %3243 = vmatpush3.msra.mxu1 %v3736_v10  ;;  %v155_v46 = vsub.f32 %v4088_v20, %v154_v19  ;;  %v146_v29 = vand.u32 4294901760, %v145_v43  ;;  %v4698_v43 = vand.u32 4294901760, %v3942_v32 }
  0x38   :  { %3214 = vmatprep.subr.mxu0 %v3864_v53  ;;  %3244 = vmatprep.subr.mxu1 %v3738_v11 }
  0x39   :  { %3215 = vmatpush3.msra.mxu0 %v3864_v53  ;;  %3245 = vmatpush3.msra.mxu1 %v3738_v11  ;;  %v156_v53 = vand.u32 4294901760, %v155_v46  ;;  %v4699_v46 = vand.u32 4294901760, %v4082_v55 }
  0x3a   :  { %3216 = vmatprep.subr.mxu0 %v3888_v60  ;;  %3246 = vmatprep.subr.mxu1 %v3753_v16 }
  0x3b   :  { %3217 = vmatpush3.msra.mxu0 %v3888_v60  ;;  %3247 = vmatpush3.msra.mxu1 %v3753_v16 }
  0x3c   :  { %3218 = vmatprep.subr.mxu0 %v3911_v6  ;;  %3248 = vmatprep.subr.mxu1 %v3778_v24 }
  0x3d   :  { %3219 = vmatpush3.msra.mxu0 %v3911_v6  ;;  %3249 = vmatpush3.msra.mxu1 %v3778_v24 }
  0x3e   :  { %3220 = vmatprep.subr.mxu0 %v3934_v30  ;;  %3250 = vmatprep.subr.mxu1 %v3787_v27 }
  0x3f   :  { %3221 = vmatpush3.msra.mxu0 %v3934_v30  ;;  %3251 = vmatpush3.msra.mxu1 %v3787_v27 }
  0x40   :  { %3222 = vmatprep.subr.mxu0 %v3958_v48  ;;  %3252 = vmatprep.subr.mxu1 %v3806_v34 }
  0x41   :  { %3155 = vmatprep.mubr.f32.mxu0 %v146_v29  ;;  %3223 = vmatpush3.msra.mxu0 %v3958_v48  ;;  %v4697_v29 = vand.u32 4294901760, %v3931_v25 }
  0x42   :  { %3253 = vmatpush3.msra.mxu1 %v3806_v34  ;;  %3156 = vmatmul.mubr.f32.gmra.mxu0 %v156_v53 }
  0x43   :  { %3224 = vmatprep.subr.mxu0 %v3974_v54  ;;  %3254 = vmatprep.subr.mxu1 %v3837_v45 }
  0x44   :  { %3225 = vmatpush3.msra.mxu0 %v3974_v54  ;;  %3255 = vmatpush3.msra.mxu1 %v3837_v45 }
  0x45   :  { %3226 = vmatprep.subr.mxu0 %v3988_v59  ;;  %3256 = vmatprep.subr.mxu1 %v3844_v47 }
  0x46   :  { %3227 = vmatpush3.msra.mxu0 %v3988_v59  ;;  %3228 = vmatprep.mubr.f32.mxu0 %v3931_v25 }
  0x47   :  { %3257 = vmatpush3.msra.mxu1 %v3844_v47  ;;  %3193 = vmatprep.mubr.f32.mxu1 %v4067_v18 }
  0x48   :  { %3229 = vmatmul.mubr.f32.vlgmr.msra.gmra.mxu0 %v3942_v32  ;;  %3258 = vmatprep.subr.mxu1 %v3879_v57 }
  0x49   :  { %3272 = vmatprep.subr.mxu0 %v3770_v21  ;;  %3194 = vmatmul.mubr.f32.gmra.mxu1 %v4072_v0 }
  0x4a   :  { %3259 = vmatpush3.msra.mxu1 %v3879_v57  ;;  %3273 = vmatpush3.msra.mxu0 %v3770_v21 }
  0x4b   :  { %3260 = vmatprep.subr.mxu1 %v3917_v8  ;;  %3274 = vmatprep.subr.mxu0 %v3773_v22 }
  0x4c   :  { %3231 = vmatprep.mubr.f32.mxu0 %v4082_v55  ;;  %3261 = vmatpush3.msra.mxu1 %v3917_v8 }
  0x4d   :  { %3275 = vmatpush3.msra.mxu0 %v3773_v22  ;;  %3262 = vmatprep.subr.mxu1 %v3938_v31 }
  0x4e   :  { %3232 = vmatmul.mubr.f32.gmra.mxu0 %v4088_v20  ;;  %3276 = vmatprep.subr.mxu0 %v3776_v23 }
  0x4f   :  { %3263 = vmatpush3.msra.mxu1 %v3938_v31  ;;  %3277 = vmatpush3.msra.mxu0 %v3776_v23 }
  0x50   :  { %3264 = vmatprep.subr.mxu1 %v3955_v41  ;;  %3278 = vmatprep.subr.mxu0 %v3785_v26 }
  0x51   :  { %3265 = vmatpush3.msra.mxu1 %v3955_v41  ;;  %3266 = vmatprep.mubr.f32.mxu1 %v4697_v29 }
  0x52   :  { %3279 = vmatpush3.msra.mxu0 %v3785_v26  ;;  %3267 = vmatmul.mubr.f32.vlgmr.msra.gmra.mxu1 %v4698_v43 }
  0x53   :  { %3280 = vmatprep.subr.mxu0 %v3790_v28  ;;  %3310 = vmatprep.subr.mxu1 %v3719_v3 }
  0x54   :  { %3281 = vmatpush3.msra.mxu0 %v3790_v28  ;;  %3311 = vmatpush3.msra.mxu1 %v3719_v3 }
  0x55   :  { %3282 = vmatprep.subr.mxu0 %v3819_v39  ;;  %3312 = vmatprep.subr.mxu1 %v3721_v4 }
  0x56   :  { %3269 = vmatprep.mubr.f32.mxu1 %v4699_v46  ;;  %3283 = vmatpush3.msra.mxu0 %v3819_v39 }
  0x57   :  { %3313 = vmatpush3.msra.mxu1 %v3721_v4  ;;  %3284 = vmatprep.subr.mxu0 %v3828_v42 }
  0x58   :  { %3270 = vmatmul.mubr.f32.gmra.mxu1 %v154_v19  ;;  %3314 = vmatprep.subr.mxu1 %v3723_v5  ;;  %v40_v19 = vld [vmem:[%s4564_s4] sm:$0xf] }
  0x59   :  { %3285 = vmatpush3.msra.mxu0 %v3828_v42  ;;  %3315 = vmatpush3.msra.mxu1 %v3723_v5  ;;  %v830_v20 = vsel %vm828_vm0, %v40_v19, 0 }
  0x5a   :  { %3286 = vmatprep.subr.mxu0 %v3861_v52  ;;  %3316 = vmatprep.subr.mxu1 %v3734_v9  ;;  %v4233_v53 = vand.u32 4294901760, %v830_v20 }
  0x5b   :  { %3287 = vmatpush3.msra.mxu0 %v3861_v52  ;;  %3317 = vmatpush3.msra.mxu1 %v3734_v9 }
  0x5c   :  { %3288 = vmatprep.subr.mxu0 %v3882_v58  ;;  %3318 = vmatprep.subr.mxu1 %v3736_v10 }
  0x5d   :  { %3289 = vmatpush3.msra.mxu0 %v3882_v58  ;;  %3319 = vmatpush3.msra.mxu1 %v3736_v10 }
  0x5e   :  { %3290 = vmatprep.subr.mxu0 %v3905_v1  ;;  %3320 = vmatprep.subr.mxu1 %v3738_v11 }
  0x5f   :  { %3291 = vmatpush3.msra.mxu0 %v3905_v1  ;;  %3321 = vmatpush3.msra.mxu1 %v3738_v11 }
  0x60   :  { %3292 = vmatprep.subr.mxu0 %v3924_v13  ;;  %3322 = vmatprep.subr.mxu1 %v3753_v16 }
  0x61   :  { %3293 = vmatpush3.msra.mxu0 %v3924_v13  ;;  %3323 = vmatpush3.msra.mxu1 %v3753_v16 }
  0x62   :  { %3294 = vmatprep.subr.mxu0 %v3951_v40  ;;  %3324 = vmatprep.subr.mxu1 %v3778_v24 }
  0x63   :  { %3295 = vmatpush3.msra.mxu0 %v3951_v40  ;;  %3325 = vmatpush3.msra.mxu1 %v3778_v24 }
  0x64   :  { %3296 = vmatprep.subr.mxu0 %v3968_v49  ;;  %3326 = vmatprep.subr.mxu1 %v3787_v27 }
  0x65   :  { %3297 = vmatpush3.msra.mxu0 %v3968_v49  ;;  %3327 = vmatpush3.msra.mxu1 %v3787_v27 }
  0x66   :  { %3298 = vmatprep.subr.mxu0 %v3985_v7  ;;  %3328 = vmatprep.subr.mxu1 %v3806_v34 }
  0x67   :  { %3299 = vmatpush3.msra.mxu0 %v3985_v7  ;;  %3329 = vmatpush3.msra.mxu1 %v3806_v34 }
  0x68   :  { %3300 = vmatprep.subr.mxu0 %v4005_v50  ;;  %3330 = vmatprep.subr.mxu1 %v3837_v45 }
  0x69   :  { %3301 = vmatpush3.msra.mxu0 %v4005_v50  ;;  %3331 = vmatpush3.msra.mxu1 %v3837_v45 }
  0x6a   :  { %3302 = vmatprep.subr.mxu0 %v4016_v51  ;;  %3332 = vmatprep.subr.mxu1 %v3844_v47 }
  0x6b   :  { %3303 = vmatpush3.msra.mxu0 %v4016_v51  ;;  %3304 = vmatprep.mubr.f32.mxu0 %v3891_v61 }
  0x6c   :  { %3333 = vmatpush3.msra.mxu1 %v3844_v47  ;;  %3305 = vmatmul.mubr.f32.vlgmr.msra.gmra.mxu0 %v3896_v62 }
  0x6d   :  { %3334 = vmatprep.subr.mxu1 %v3879_v57  ;;  %3307 = vmatprep.mubr.f32.mxu0 %v4067_v18 }
  0x6e   :  { %3335 = vmatpush3.msra.mxu1 %v3879_v57  ;;  %3342 = vmatprep.mubr.f32.mxu1 %v3891_v61  ;;  %v4236_v61 = vsub.f32 %v830_v20, %v4233_v53 }
  0x6f   :  { %3336 = vmatprep.subr.mxu1 %v3917_v8  ;;  %3348 = vmatprep.subr.mxu0 %v4233_v53 }
  0x70   :  { %3337 = vmatpush3.msra.mxu1 %v3917_v8  ;;  %3308 = vmatmul.mubr.f32.gmra.mxu0 %v4072_v0 }
  0x71   :  { %3338 = vmatprep.subr.mxu1 %v3938_v31  ;;  %3349 = vmatpush3.msra.mxu0 %v4233_v53 }
  0x72   :  { %3339 = vmatpush3.msra.mxu1 %v3938_v31  ;;  %3364 = vmatprep.subr.mxu0 %v4236_v61 }
  0x73   :  { %3340 = vmatprep.subr.mxu1 %v3955_v41 }
  0x74   :  { %3341 = vmatpush3.msra.mxu1 %v3955_v41 }
  0x75   :  { %3343 = vmatmul.mubr.f32.vlgmr.msra.gmra.mxu1 %v3896_v62  ;;  %v4241_v62 = vand.u32 4294901760, %v4236_v61 }
  0x76   :  { %3345 = vmatprep.mubr.f32.mxu1 %v4067_v18 }
  0x77   :  { %v972_v25 = vsub.f32 %v4236_v61, %v4241_v62 }
  0x79   :  { %3346 = vmatmul.mubr.f32.gmra.mxu1 %v4072_v0  ;;  %v4246_v32 = vand.u32 4294901760, %v972_v25 }
  0x7b   :  { %4700 = vst [vmem:[#allocation44_spill] sm:$0xff] %v4246_v32  ;;  %3356 = vmatprep.subr.mxu1 %v4246_v32 }
  0x7c   :  { %3357 = vmatpush3.msra.mxu1 %v4246_v32 }
  0x7d   :  { %3372 = vmatprep.subr.mxu1 %v4233_v53 }
  0xe5   :  { %v3154_v18 = vpop.f32.mrf.mxu0 }
  0xe7   :  { %v128_v0 = vpop.f32.mrf.mxu0 }
  0xed   :  { %v3192_v43 = vpop.f32.mrf.mxu1 }
  0xee   :  { %v316_v1 = vadd.f32 %v3192_v43, %v3154_v18 }
  0xef   :  { %v309_v19 = vpop.f32.mrf.mxu1 }
  0xf0   :  { %v310_v52 = vadd.f32 %v309_v19, %v128_v0 }
 0x102   :  { %v3157_v55 = vpop.f32.mrf.mxu0 }
 0x104   :  { %v148_v29 = vpop.f32.mrf.mxu0 }
 0x108   :  { %v3230_v46 = vpop.f32.mrf.mxu0 }
 0x109   :  { %v3195_v20 = vpop.f32.mrf.mxu1  ;;  %v439_v42 = vadd.f32 %v3230_v46, %v316_v1 }
 0x10a   :  { %v431_v51 = vpop.f32.mrf.mxu0  ;;  %v328_v39 = vadd.f32 %v3195_v20, %v3157_v55 }
 0x10b   :  { %v321_v50 = vpop.f32.mrf.mxu1  ;;  %v432_v28 = vadd.f32 %v431_v51, %v310_v52 }
 0x10c   :  { %v322_v26 = vadd.f32 %v321_v50, %v148_v29 }
 0x10e   :  { %v3233_v7 = vpop.f32.mrf.mxu0 }
 0x10f   :  { %v453_v59 = vadd.f32 %v3233_v7, %v328_v39 }
 0x110   :  { %v445_v25 = vpop.f32.mrf.mxu0 }
 0x111   :  { %v446_v6 = vadd.f32 %v445_v25, %v322_v26 }
 0x112   :  { %v3268_v49 = vpop.f32.mrf.mxu1 }
 0x113   :  { %v550_v23 = vadd.f32 %v3268_v49, %v439_v42 }
 0x114   :  { %v541_v40 = vpop.f32.mrf.mxu1 }
 0x115   :  { %v542_v54 = vadd.f32 %v541_v40, %v432_v28 }
 0x118   :  { %v3271_v58 = vpop.f32.mrf.mxu1 }
 0x119   :  { %v566_v60 = vadd.f32 %v3271_v58, %v453_v59 }
 0x11a   :  { %v557_v22 = vpop.f32.mrf.mxu1 }
 0x11b   :  { %v558_v43 = vadd.f32 %v557_v22, %v446_v6 }
 0x12c   :  { %v3306_v13 = vpop.f32.mrf.mxu0 }
 0x12d   :  { %v691_v48 = vadd.f32 %v3306_v13, %v550_v23 }
 0x12e   :  { %v684_v32 = vpop.f32.mrf.mxu0 }
 0x12f   :  { %v685_v33 = vadd.f32 %v684_v32, %v542_v54 }
 0x130   :  { %v3309_v21 = vpop.f32.mrf.mxu0 }
 0x131   :  { %v703_v0 = vadd.f32 %v3309_v21, %v566_v60 }
 0x132   :  { %v696_v15 = vpop.f32.mrf.mxu0 }
 0x133   :  { %v697_v50 = vadd.f32 %v696_v15, %v558_v43 }
 0x135   :  { %v3344_v30 = vpop.f32.mrf.mxu1 }
 0x136   :  { %v796_v17 = vadd.f32 %v3344_v30, %v691_v48 }
 0x137   :  { %v789_v18 = vpop.f32.mrf.mxu1 }
 0x138   :  { %v812_v1 = vmul.f32 0.03125, %v796_v17  ;;  %v790_v55 = vadd.f32 %v789_v18, %v685_v33 }
 0x139   :  { %v3347_v52 = vpop.f32.mrf.mxu1 }
 0x13a   :  { %v820_v42 = vsel %vm815_vm1, %v812_v1, 0  ;;  %v811_v49 = vmul.f32 0.03125, %v790_v55  ;;  %v808_v39 = vadd.f32 %v3347_v52, %v703_v0  ;;  %v4701_v0 = vld [vmem:[#allocation13_spill] sm:$0xff]  ;;  %v4703_v55 = vld [vmem:[#allocation20_spill] sm:$0xff]  ;;  %v4705_v52 = vld [vmem:[#allocation27_spill] sm:$0xff] }
 0x13b   :  { %v908_v28 = vand.u32 4294901760, %v820_v42  ;;  %v801_v23 = vpop.f32.mrf.mxu1  ;;  %v4702_v1 = vld [vmem:[#allocation17_spill] sm:$0xff] }
 0x13c   :  { %v817_v26 = vsel %vm815_vm1, %v811_v49, 0  ;;  %v814_v58 = vmul.f32 0.03125, %v808_v39  ;;  %v802_v54 = vadd.f32 %v801_v23, %v697_v50  ;;  %v4706_v50 = vld [vmem:[#allocation30_spill] sm:$0xff]  ;;  %v4708_v49 = vld [vmem:[#allocation36_spill] sm:$0xff]  ;;  %v4709_v39 = vld [vmem:[#allocation39_spill] sm:$0xff] }
 0x13d   :  { %v909_v7 = vsub.f32 %v820_v42, %v908_v28  ;;  %v898_v13 = vand.u32 4294901760, %v817_v26  ;;  %v4707_v42 = vld [vmem:[#allocation33_spill] sm:$0xff] }
 0x13e   :  { %v826_v30 = vsel %vm815_vm1, %v814_v58, 0  ;;  %v813_v22 = vmul.f32 0.03125, %v802_v54 }
 0x13f   :  { %v910_v21 = vand.u32 4294901760, %v909_v7  ;;  %v899_v17 = vsub.f32 %v817_v26, %v898_v13  ;;  %v928_v33 = vand.u32 4294901760, %v826_v30  ;;  %3358 = vmatprep.mubr.f32.mxu1 %v898_v13 }
 0x140   :  { %v823_v15 = vsel %vm815_vm1, %v813_v22, 0  ;;  %3359 = vmatmul.mubr.f32.vlgmr.msra.gmra.mxu1 %v908_v28 }
 0x141   :  { %v929_v60 = vsub.f32 %v826_v30, %v928_v33  ;;  %v918_v6 = vand.u32 4294901760, %v823_v15  ;;  %v900_v40 = vand.u32 4294901760, %v899_v17  ;;  %3373 = vmatpush3.msra.mxu1 %v4233_v53  ;;  %v911_v48 = vsub.f32 %v909_v7, %v910_v21 }
 0x142   :  { %3388 = vmatprep.subr.mxu1 %v4233_v53 }
 0x143   :  { %v919_v51 = vsub.f32 %v823_v15, %v918_v6  ;;  %3361 = vmatprep.mubr.f32.mxu1 %v918_v6  ;;  %v901_v59 = vsub.f32 %v899_v17, %v900_v40  ;;  %v930_v32 = vand.u32 4294901760, %v929_v60  ;;  %v912_v19 = vand.u32 4294901760, %v911_v48 }
 0x144   :  { %3362 = vmatmul.mubr.f32.gmra.mxu1 %v928_v33 }
 0x145   :  { %3374 = vmatprep.mubr.f32.mxu1 %v900_v40  ;;  %v902_v29 = vand.u32 4294901760, %v901_v59  ;;  %v920_v46 = vand.u32 4294901760, %v919_v51  ;;  %v931_v20 = vsub.f32 %v929_v60, %v930_v32 }
 0x147   :  { %3350 = vmatprep.mubr.f32.mxu0 %v902_v29  ;;  %v921_v25 = vsub.f32 %v919_v51, %v920_v46  ;;  %v932_v43 = vand.u32 4294901760, %v931_v20 }
 0x148   :  { %3351 = vmatmul.mubr.f32.vlgmr.msra.gmra.mxu0 %v912_v19  ;;  %3375 = vmatmul.mubr.f32.vlgmr.msra.gmra.mxu1 %v910_v21 }
 0x149   :  { %3365 = vmatpush3.msra.mxu0 %v4236_v61  ;;  %3377 = vmatprep.mubr.f32.mxu1 %v920_v46  ;;  %v922_v18 = vand.u32 4294901760, %v921_v25 }
 0x14a   :  { %3380 = vmatprep.subr.mxu0 %v4241_v62  ;;  %3389 = vmatpush3.msra.mxu1 %v4233_v53 }
 0x14b   :  { %3353 = vmatprep.mubr.f32.mxu0 %v922_v18  ;;  %3434 = vmatprep.subr.mxu1 %v3812_v36 }
 0x14c   :  { %3354 = vmatmul.mubr.f32.gmra.mxu0 %v932_v43  ;;  %3378 = vmatmul.mubr.f32.gmra.mxu1 %v930_v32 }
 0x14d   :  { %3366 = vmatprep.mubr.f32.mxu0 %v899_v17  ;;  %3390 = vmatprep.mubr.f32.mxu1 %v898_v13 }
 0x150   :  { %3367 = vmatmul.mubr.f32.vlgmr.msra.gmra.mxu0 %v909_v7  ;;  %3391 = vmatmul.mubr.f32.vlgmr.msra.gmra.mxu1 %v908_v28 }
 0x151   :  { %3381 = vmatpush3.msra.mxu0 %v4241_v62  ;;  %3369 = vmatprep.mubr.f32.mxu0 %v919_v51 }
 0x152   :  { %3393 = vmatprep.mubr.f32.mxu1 %v918_v6  ;;  %3435 = vmatpush3.msra.mxu1 %v3812_v36  ;;  %v4704_v36 = vld [vmem:[#allocation24_spill] sm:$0xff] }
 0x153   :  { %3436 = vmatprep.subr.mxu1 %v4701_v0  ;;  %3396 = vmatprep.subr.mxu0 %v3719_v3 }
 0x154   :  { %3370 = vmatmul.mubr.f32.gmra.mxu0 %v929_v60  ;;  %3394 = vmatmul.mubr.f32.gmra.mxu1 %v928_v33 }
 0x155   :  { %3382 = vmatprep.mubr.f32.mxu0 %v898_v13  ;;  %3437 = vmatpush3.msra.mxu1 %v4701_v0 }
 0x156   :  { %3438 = vmatprep.subr.mxu1 %v4702_v1 }
 0x157   :  { %3439 = vmatpush3.msra.mxu1 %v4702_v1 }
 0x158   :  { %3383 = vmatmul.mubr.f32.vlgmr.msra.gmra.mxu0 %v908_v28  ;;  %3440 = vmatprep.subr.mxu1 %v4703_v55 }
 0x159   :  { %3385 = vmatprep.mubr.f32.mxu0 %v918_v6  ;;  %3441 = vmatpush3.msra.mxu1 %v4703_v55 }
 0x15a   :  { %3442 = vmatprep.subr.mxu1 %v4704_v36  ;;  %3397 = vmatpush3.msra.mxu0 %v3719_v3 }
 0x15b   :  { %3443 = vmatpush3.msra.mxu1 %v4704_v36  ;;  %3398 = vmatprep.subr.mxu0 %v3721_v4  ;;  %v4710_v36 = vld [vmem:[#allocation23_spill] sm:$0xff] }
 0x15c   :  { %3386 = vmatmul.mubr.f32.gmra.mxu0 %v928_v33  ;;  %3444 = vmatprep.subr.mxu1 %v4705_v52 }
 0x15d   :  { %3399 = vmatpush3.msra.mxu0 %v3721_v4  ;;  %3445 = vmatpush3.msra.mxu1 %v4705_v52 }
 0x15e   :  { %3400 = vmatprep.subr.mxu0 %v3723_v5  ;;  %3446 = vmatprep.subr.mxu1 %v4706_v50 }
 0x15f   :  { %3401 = vmatpush3.msra.mxu0 %v3723_v5  ;;  %3447 = vmatpush3.msra.mxu1 %v4706_v50 }
 0x160   :  { %3402 = vmatprep.subr.mxu0 %v3734_v9  ;;  %3448 = vmatprep.subr.mxu1 %v4707_v42 }
 0x161   :  { %3403 = vmatpush3.msra.mxu0 %v3734_v9  ;;  %3449 = vmatpush3.msra.mxu1 %v4707_v42 }
 0x162   :  { %3404 = vmatprep.subr.mxu0 %v3736_v10  ;;  %3450 = vmatprep.subr.mxu1 %v4708_v49 }
 0x163   :  { %3405 = vmatpush3.msra.mxu0 %v3736_v10  ;;  %3451 = vmatpush3.msra.mxu1 %v4708_v49 }
 0x164   :  { %3406 = vmatprep.subr.mxu0 %v3738_v11  ;;  %3452 = vmatprep.subr.mxu1 %v4709_v39 }
 0x165   :  { %3407 = vmatpush3.msra.mxu0 %v3738_v11  ;;  %3453 = vmatpush3.msra.mxu1 %v4709_v39 }
 0x166   :  { %3408 = vmatprep.subr.mxu0 %v3753_v16  ;;  %3454 = vmatprep.subr.mxu1 %v3992_v2 }
 0x167   :  { %3409 = vmatpush3.msra.mxu0 %v3753_v16  ;;  %3455 = vmatpush3.msra.mxu1 %v3992_v2 }
 0x168   :  { %3410 = vmatprep.subr.mxu0 %v3778_v24  ;;  %3456 = vmatprep.subr.mxu1 %v4009_v56 }
 0x169   :  { %3411 = vmatpush3.msra.mxu0 %v3778_v24  ;;  %3457 = vmatpush3.msra.mxu1 %v4009_v56 }
 0x16a   :  { %3412 = vmatprep.subr.mxu0 %v3787_v27  ;;  %3458 = vmatprep.subr.mxu1 %v4020_v44 }
 0x16b   :  { %3413 = vmatpush3.msra.mxu0 %v3787_v27  ;;  %3459 = vmatpush3.msra.mxu1 %v4020_v44 }
 0x16c   :  { %3414 = vmatprep.subr.mxu0 %v3806_v34  ;;  %3460 = vmatprep.subr.mxu1 %v4030_v37 }
 0x16d   :  { %3415 = vmatpush3.msra.mxu0 %v3806_v34  ;;  %3461 = vmatpush3.msra.mxu1 %v4030_v37 }
 0x16e   :  { %3416 = vmatprep.subr.mxu0 %v3837_v45  ;;  %3462 = vmatprep.subr.mxu1 %v4036_v63 }
 0x16f   :  { %3417 = vmatpush3.msra.mxu0 %v3837_v45  ;;  %3463 = vmatpush3.msra.mxu1 %v4036_v63 }
 0x170   :  { %3418 = vmatprep.subr.mxu0 %v3844_v47  ;;  %3464 = vmatprep.subr.mxu1 %v4042_v35 }
 0x171   :  { %3419 = vmatpush3.msra.mxu0 %v3844_v47  ;;  %3465 = vmatpush3.msra.mxu1 %v4042_v35 }
 0x172   :  { %3420 = vmatprep.subr.mxu0 %v3879_v57  ;;  %3510 = vmatprep.subr.mxu1 %v3719_v3 }
 0x173   :  { %3421 = vmatpush3.msra.mxu0 %v3879_v57 }
 0x174   :  { %3422 = vmatprep.subr.mxu0 %v3917_v8 }
 0x175   :  { %3423 = vmatpush3.msra.mxu0 %v3917_v8 }
 0x176   :  { %3424 = vmatprep.subr.mxu0 %v3938_v31 }
 0x177   :  { %3425 = vmatpush3.msra.mxu0 %v3938_v31 }
 0x178   :  { %3426 = vmatprep.subr.mxu0 %v3955_v41 }
 0x179   :  { %3427 = vmatpush3.msra.mxu0 %v3955_v41 }
 0x17a   :  { %3472 = vmatprep.subr.mxu0 %v3748_v14 }
 0x200   :  { %v3360_v37 = vpop.f32.mrf.mxu1 }
 0x202   :  { %v1010_v44 = vpop.f32.mrf.mxu1 }
 0x204   :  { %v3363_v2 = vpop.f32.mrf.mxu1 }
 0x206   :  { %v1022_v56 = vpop.f32.mrf.mxu1 }
 0x208   :  { %v3352_v63 = vpop.f32.mrf.mxu0  ;;  %v3376_v35 = vpop.f32.mrf.mxu1 }
 0x209   :  { %v1017_v30 = vadd.f32 %v3360_v37, %v3352_v63 }
 0x20a   :  { %v904_v28 = vpop.f32.mrf.mxu0  ;;  %v1197_v23 = vpop.f32.mrf.mxu1 }
 0x20b   :  { %v1011_v21 = vadd.f32 %v1010_v44, %v904_v28  ;;  %v4711_v44 = vld [vmem:[#allocation19_spill] sm:$0xff] }
 0x20c   :  { %v3355_v26 = vpop.f32.mrf.mxu0  ;;  %v3379_v58 = vpop.f32.mrf.mxu1 }
 0x20d   :  { %v1029_v60 = vadd.f32 %v3363_v2, %v3355_v26 }
 0x20e   :  { %v924_v54 = vpop.f32.mrf.mxu0  ;;  %v1213_v7 = vpop.f32.mrf.mxu1 }
 0x20f   :  { %v1023_v48 = vadd.f32 %v1022_v56, %v924_v54 }
 0x210   :  { %v3368_v13 = vpop.f32.mrf.mxu0  ;;  %v3392_v33 = vpop.f32.mrf.mxu1 }
 0x211   :  { %v1110_v17 = vadd.f32 %v3368_v13, %v1017_v30 }
 0x212   :  { %v1102_v22 = vpop.f32.mrf.mxu0  ;;  %v1385_v32 = vpop.f32.mrf.mxu1 }
 0x213   :  { %v1103_v6 = vadd.f32 %v1102_v22, %v1011_v21  ;;  %v1206_v59 = vadd.f32 %v3376_v35, %v1110_v17 }
 0x214   :  { %v3371_v15 = vpop.f32.mrf.mxu0  ;;  %v3395_v1 = vpop.f32.mrf.mxu1 }
 0x215   :  { %v1124_v51 = vadd.f32 %v3371_v15, %v1029_v60  ;;  %v1198_v20 = vadd.f32 %v1197_v23, %v1103_v6 }
 0x216   :  { %v1116_v40 = vpop.f32.mrf.mxu0  ;;  %v1397_v35 = vpop.f32.mrf.mxu1 }
 0x217   :  { %v1117_v46 = vadd.f32 %v1116_v40, %v1023_v48  ;;  %v1222_v0 = vadd.f32 %v3379_v58, %v1124_v51 }
 0x218   :  { %v3384_v29 = vpop.f32.mrf.mxu0 }
 0x219   :  { %v1302_v19 = vadd.f32 %v3384_v29, %v1206_v59  ;;  %v1214_v49 = vadd.f32 %v1213_v7, %v1117_v46 }
 0x21a   :  { %v1295_v25 = vpop.f32.mrf.mxu0 }
 0x21b   :  { %v1392_v18 = vadd.f32 %v3392_v33, %v1302_v19  ;;  %v1296_v43 = vadd.f32 %v1295_v25, %v1198_v20  ;;  %v4712_v20 = vld [vmem:[#allocation2_spill] sm:$0xff] }
 0x21c   :  { %v3387_v55 = vpop.f32.mrf.mxu0 }
 0x21d   :  { %v4328_v52 = vsub.f32 %v4710_v36, %v1392_v18  ;;  %v1386_v50 = vadd.f32 %v1385_v32, %v1296_v43  ;;  %v1314_v42 = vadd.f32 %v3387_v55, %v1222_v0  ;;  %v4713_v18 = vld [vmem:[#allocation3_spill] sm:$0xff]  ;;  %v4715_v43 = vld [vmem:[#allocation5_spill] sm:$0xff]  ;;  %v4718_v55 = vld [vmem:[#allocation16_spill] sm:$0xff] }
 0x21e   :  { %v1307_v39 = vpop.f32.mrf.mxu0  ;;  %v4716_v0 = vld [vmem:[#allocation11_spill] sm:$0xff]  ;;  %v4719_v36 = vld [vmem:[#allocation18_spill] sm:$0xff] }
 0x21f   :  { %v1412_v37 = vmul.f32 %v4328_v52, %v4328_v52  ;;  %v4333_v2 = vsub.f32 %v4711_v44, %v1386_v50  ;;  %v1404_v56 = vadd.f32 %v3395_v1, %v1314_v42  ;;  %v1308_v63 = vadd.f32 %v1307_v39, %v1214_v49  ;;  %v4717_v1 = vld [vmem:[#allocation12_spill] sm:$0xff]  ;;  %v4720_v50 = vld [vmem:[#allocation22_spill] sm:$0xff]  ;;  %v4722_v49 = vld [vmem:[#allocation29_spill] sm:$0xff] }
 0x220   :  { %v4721_v42 = vld [vmem:[#allocation26_spill] sm:$0xff]  ;;  %v4723_v39 = vld [vmem:[#allocation32_spill] sm:$0xff] }
 0x221   :  { %v4335_v28 = vand.u32 4294901760, %v1412_v37  ;;  %v1411_v23 = vmul.f32 %v4333_v2, %v4333_v2  ;;  %v4340_v26 = vsub.f32 %v4060_v38, %v1404_v56  ;;  %v1398_v58 = vadd.f32 %v1397_v35, %v1308_v63  ;;  %v4725_v44 = vld [vmem:[#allocation38_spill] sm:$0xff] }
 0x222   :  { %v4732_v56 = vld [vmem:[#allocation14_spill] sm:$0xff] }
 0x223   :  { %v4343_v54 = vsub.f32 %v1412_v37, %v4335_v28  ;;  %v1414_v7 = vmul.f32 %v4340_v26, %v4340_v26  ;;  %v4348_v13 = vsub.f32 %v4053_v12, %v1398_v58  ;;  %v4350_v30 = vand.u32 4294901760, %v1411_v23  ;;  %v4724_v37 = vld [vmem:[#allocation35_spill] sm:$0xff]  ;;  %v4742_v63 = vld [vmem:[#allocation42_spill] sm:$0xff] }
 0x225   :  { %v1508_v22 = vand.u32 4294901760, %v4343_v54  ;;  %v1413_v21 = vmul.f32 %v4348_v13, %v4348_v13  ;;  %3466 = vmatprep.mubr.f32.mxu1 %v4350_v30  ;;  %v4356_v38 = vand.u32 4294901760, %v1414_v7  ;;  %v1497_v17 = vsub.f32 %v1411_v23, %v4350_v30 }
 0x226   :  { %3467 = vmatmul.mubr.f32.vlgmr.msra.gmra.mxu1 %v4335_v28 }
 0x227   :  { %3511 = vmatpush3.msra.mxu1 %v3719_v3  ;;  %v4361_v33 = vand.u32 4294901760, %v1413_v21  ;;  %v1498_v12 = vand.u32 4294901760, %v1497_v17  ;;  %v4364_v15 = vsub.f32 %v1414_v7, %v4356_v38  ;;  %v1509_v60 = vsub.f32 %v4343_v54, %v1508_v22 }
 0x228   :  { %3512 = vmatprep.subr.mxu1 %v3721_v4 }
 0x229   :  { %3513 = vmatpush3.msra.mxu1 %v3721_v4  ;;  %3469 = vmatprep.mubr.f32.mxu1 %v4361_v33  ;;  %v1499_v6 = vsub.f32 %v1497_v17, %v1498_v12  ;;  %v4373_v40 = vsub.f32 %v1413_v21, %v4361_v33  ;;  %v1528_v48 = vand.u32 4294901760, %v4364_v15  ;;  %v1510_v32 = vand.u32 4294901760, %v1509_v60 }
 0x22a   :  { %3514 = vmatprep.subr.mxu1 %v3723_v5  ;;  %3470 = vmatmul.mubr.f32.gmra.mxu1 %v4356_v38 }
 0x22b   :  { %3515 = vmatpush3.msra.mxu1 %v3723_v5  ;;  %3542 = vmatprep.mubr.f32.mxu1 %v1498_v12  ;;  %v1500_v51 = vand.u32 4294901760, %v1499_v6  ;;  %v1518_v59 = vand.u32 4294901760, %v4373_v40  ;;  %v1529_v46 = vsub.f32 %v4364_v15, %v1528_v48 }
 0x22c   :  { %3516 = vmatprep.subr.mxu1 %v3734_v9 }
 0x22d   :  { %3517 = vmatpush3.msra.mxu1 %v3734_v9  ;;  %3428 = vmatprep.mubr.f32.mxu0 %v1500_v51  ;;  %v1519_v29 = vsub.f32 %v4373_v40, %v1518_v59  ;;  %v1530_v25 = vand.u32 4294901760, %v1529_v46 }
 0x22e   :  { %3518 = vmatprep.subr.mxu1 %v3736_v10  ;;  %3429 = vmatmul.mubr.f32.vlgmr.msra.gmra.mxu0 %v1510_v32 }
 0x22f   :  { %3473 = vmatpush3.msra.mxu0 %v3748_v14  ;;  %3519 = vmatpush3.msra.mxu1 %v3736_v10  ;;  %v1520_v19 = vand.u32 4294901760, %v1519_v29  ;;  %v4714_v14 = vld [vmem:[#allocation4_spill] sm:$0xff] }
 0x230   :  { %3474 = vmatprep.subr.mxu0 %v4712_v20  ;;  %3520 = vmatprep.subr.mxu1 %v3738_v11 }
 0x231   :  { %3475 = vmatpush3.msra.mxu0 %v4712_v20  ;;  %3521 = vmatpush3.msra.mxu1 %v3738_v11 }
 0x232   :  { %3431 = vmatprep.mubr.f32.mxu0 %v1520_v19  ;;  %3476 = vmatprep.subr.mxu0 %v4713_v18 }
 0x233   :  { %3522 = vmatprep.subr.mxu1 %v3753_v16  ;;  %3432 = vmatmul.mubr.f32.gmra.mxu0 %v1530_v25 }
 0x234   :  { %3477 = vmatpush3.msra.mxu0 %v4713_v18  ;;  %3523 = vmatpush3.msra.mxu1 %v3753_v16 }
 0x235   :  { %3478 = vmatprep.subr.mxu0 %v4714_v14  ;;  %3504 = vmatprep.mubr.f32.mxu0 %v1497_v17 }
 0x236   :  { %3524 = vmatprep.subr.mxu1 %v3778_v24  ;;  %3479 = vmatpush3.msra.mxu0 %v4714_v14 }
 0x237   :  { %3525 = vmatpush3.msra.mxu1 %v3778_v24  ;;  %3480 = vmatprep.subr.mxu0 %v4715_v43 }
 0x238   :  { %3526 = vmatprep.subr.mxu1 %v3787_v27  ;;  %3481 = vmatpush3.msra.mxu0 %v4715_v43 }
 0x239   :  { %3527 = vmatpush3.msra.mxu1 %v3787_v27  ;;  %3482 = vmatprep.subr.mxu0 %v4716_v0 }
 0x23a   :  { %3528 = vmatprep.subr.mxu1 %v3806_v34  ;;  %3483 = vmatpush3.msra.mxu0 %v4716_v0 }
 0x23b   :  { %3529 = vmatpush3.msra.mxu1 %v3806_v34  ;;  %3484 = vmatprep.subr.mxu0 %v4717_v1 }
 0x23c   :  { %3530 = vmatprep.subr.mxu1 %v3837_v45  ;;  %3485 = vmatpush3.msra.mxu0 %v4717_v1 }
 0x23d   :  { %3531 = vmatpush3.msra.mxu1 %v3837_v45  ;;  %3486 = vmatprep.subr.mxu0 %v4718_v55 }
 0x23e   :  { %3532 = vmatprep.subr.mxu1 %v3844_v47  ;;  %3487 = vmatpush3.msra.mxu0 %v4718_v55 }
 0x23f   :  { %3533 = vmatpush3.msra.mxu1 %v3844_v47  ;;  %3488 = vmatprep.subr.mxu0 %v4719_v36 }
 0x240   :  { %3534 = vmatprep.subr.mxu1 %v3879_v57  ;;  %3489 = vmatpush3.msra.mxu0 %v4719_v36 }
 0x241   :  { %3535 = vmatpush3.msra.mxu1 %v3879_v57  ;;  %3490 = vmatprep.subr.mxu0 %v4720_v50 }
 0x242   :  { %3536 = vmatprep.subr.mxu1 %v3917_v8  ;;  %3491 = vmatpush3.msra.mxu0 %v4720_v50 }
 0x243   :  { %3537 = vmatpush3.msra.mxu1 %v3917_v8  ;;  %3492 = vmatprep.subr.mxu0 %v4721_v42 }
 0x244   :  { %3538 = vmatprep.subr.mxu1 %v3938_v31  ;;  %3493 = vmatpush3.msra.mxu0 %v4721_v42 }
 0x245   :  { %3539 = vmatpush3.msra.mxu1 %v3938_v31  ;;  %3494 = vmatprep.subr.mxu0 %v4722_v49 }
 0x246   :  { %3540 = vmatprep.subr.mxu1 %v3955_v41  ;;  %3495 = vmatpush3.msra.mxu0 %v4722_v49 }
 0x247   :  { %3541 = vmatpush3.msra.mxu1 %v3955_v41  ;;  %3496 = vmatprep.subr.mxu0 %v4723_v39 }
 0x248   :  { %3543 = vmatmul.mubr.f32.vlgmr.msra.gmra.mxu1 %v1508_v22  ;;  %3586 = vmatprep.subr.mxu1 %v3719_v3 }
 0x249   :  { %3497 = vmatpush3.msra.mxu0 %v4723_v39  ;;  %3545 = vmatprep.mubr.f32.mxu1 %v1518_v59 }
 0x24a   :  { %3587 = vmatpush3.msra.mxu1 %v3719_v3  ;;  %3498 = vmatprep.subr.mxu0 %v4724_v37  ;;  %v4726_v3 = vld [vmem:[#allocation41_spill] sm:$0xff] }
 0x24b   :  { %3588 = vmatprep.subr.mxu1 %v3721_v4  ;;  %3499 = vmatpush3.msra.mxu0 %v4724_v37 }
 0x24c   :  { %3589 = vmatpush3.msra.mxu1 %v3721_v4  ;;  %3500 = vmatprep.subr.mxu0 %v4725_v44  ;;  %v4727_v4 = vld [vmem:[#allocation6_spill] sm:$0xff] }
 0x24d   :  { %3546 = vmatmul.mubr.f32.gmra.mxu1 %v1528_v48  ;;  %3590 = vmatprep.subr.mxu1 %v3723_v5 }
 0x24e   :  { %3501 = vmatpush3.msra.mxu0 %v4725_v44  ;;  %3591 = vmatpush3.msra.mxu1 %v3723_v5  ;;  %v4728_v5 = vld [vmem:[#allocation7_spill] sm:$0xff] }
 0x24f   :  { %3618 = vmatprep.mubr.f32.mxu1 %v4350_v30  ;;  %3502 = vmatprep.subr.mxu0 %v4726_v3 }
 0x250   :  { %3592 = vmatprep.subr.mxu1 %v3734_v9  ;;  %3503 = vmatpush3.msra.mxu0 %v4726_v3 }
 0x251   :  { %3593 = vmatpush3.msra.mxu1 %v3734_v9  ;;  %3505 = vmatmul.mubr.f32.vlgmr.msra.gmra.mxu0 %v4343_v54  ;;  %v4729_v9 = vld [vmem:[#allocation8_spill] sm:$0xff] }
 0x252   :  { %3548 = vmatprep.subr.mxu0 %v4727_v4  ;;  %3594 = vmatprep.subr.mxu1 %v3736_v10 }
 0x253   :  { %3507 = vmatprep.mubr.f32.mxu0 %v4373_v40  ;;  %3549 = vmatpush3.msra.mxu0 %v4727_v4 }
 0x254   :  { %3595 = vmatpush3.msra.mxu1 %v3736_v10  ;;  %3550 = vmatprep.subr.mxu0 %v4728_v5  ;;  %v4730_v10 = vld [vmem:[#allocation9_spill] sm:$0xff] }
 0x255   :  { %3596 = vmatprep.subr.mxu1 %v3738_v11  ;;  %3551 = vmatpush3.msra.mxu0 %v4728_v5 }
 0x256   :  { %3597 = vmatpush3.msra.mxu1 %v3738_v11  ;;  %3508 = vmatmul.mubr.f32.gmra.mxu0 %v4364_v15  ;;  %v4731_v11 = vld [vmem:[#allocation10_spill] sm:$0xff] }
 0x257   :  { %3552 = vmatprep.subr.mxu0 %v4729_v9  ;;  %3598 = vmatprep.subr.mxu1 %v3753_v16 }
 0x258   :  { %3553 = vmatpush3.msra.mxu0 %v4729_v9  ;;  %3580 = vmatprep.mubr.f32.mxu0 %v4350_v30 }
 0x259   :  { %3599 = vmatpush3.msra.mxu1 %v3753_v16  ;;  %3554 = vmatprep.subr.mxu0 %v4730_v10  ;;  %v4733_v16 = vld [vmem:[#allocation15_spill] sm:$0xff] }
 0x25a   :  { %3600 = vmatprep.subr.mxu1 %v3778_v24  ;;  %3555 = vmatpush3.msra.mxu0 %v4730_v10 }
 0x25b   :  { %3601 = vmatpush3.msra.mxu1 %v3778_v24  ;;  %3556 = vmatprep.subr.mxu0 %v4731_v11  ;;  %v4734_v24 = vld [vmem:[#allocation21_spill] sm:$0xff] }
 0x25c   :  { %3602 = vmatprep.subr.mxu1 %v3787_v27  ;;  %3557 = vmatpush3.msra.mxu0 %v4731_v11 }
 0x25d   :  { %3603 = vmatpush3.msra.mxu1 %v3787_v27  ;;  %3558 = vmatprep.subr.mxu0 %v4732_v56  ;;  %v4735_v27 = vld [vmem:[#allocation25_spill] sm:$0xff] }
 0x25e   :  { %3604 = vmatprep.subr.mxu1 %v3806_v34  ;;  %3559 = vmatpush3.msra.mxu0 %v4732_v56 }
 0x25f   :  { %3605 = vmatpush3.msra.mxu1 %v3806_v34  ;;  %3560 = vmatprep.subr.mxu0 %v4733_v16  ;;  %v4736_v34 = vld [vmem:[#allocation28_spill] sm:$0xff] }
 0x260   :  { %3606 = vmatprep.subr.mxu1 %v3837_v45  ;;  %3561 = vmatpush3.msra.mxu0 %v4733_v16 }
 0x261   :  { %3607 = vmatpush3.msra.mxu1 %v3837_v45  ;;  %3562 = vmatprep.subr.mxu0 %v4734_v24  ;;  %v4737_v45 = vld [vmem:[#allocation31_spill] sm:$0xff] }
 0x262   :  { %3608 = vmatprep.subr.mxu1 %v3844_v47  ;;  %3563 = vmatpush3.msra.mxu0 %v4734_v24 }
 0x263   :  { %3609 = vmatpush3.msra.mxu1 %v3844_v47  ;;  %3564 = vmatprep.subr.mxu0 %v4735_v27  ;;  %v4738_v47 = vld [vmem:[#allocation34_spill] sm:$0xff] }
 0x264   :  { %3610 = vmatprep.subr.mxu1 %v3879_v57  ;;  %3565 = vmatpush3.msra.mxu0 %v4735_v27 }
 0x265   :  { %3611 = vmatpush3.msra.mxu1 %v3879_v57  ;;  %3566 = vmatprep.subr.mxu0 %v4736_v34  ;;  %v4739_v57 = vld [vmem:[#allocation37_spill] sm:$0xff] }
 0x266   :  { %3612 = vmatprep.subr.mxu1 %v3917_v8  ;;  %3567 = vmatpush3.msra.mxu0 %v4736_v34 }
 0x267   :  { %3613 = vmatpush3.msra.mxu1 %v3917_v8  ;;  %3568 = vmatprep.subr.mxu0 %v4737_v45  ;;  %v4740_v8 = vld [vmem:[#allocation40_spill] sm:$0xff] }
 0x268   :  { %3614 = vmatprep.subr.mxu1 %v3938_v31  ;;  %3569 = vmatpush3.msra.mxu0 %v4737_v45 }
 0x269   :  { %3615 = vmatpush3.msra.mxu1 %v3938_v31  ;;  %3570 = vmatprep.subr.mxu0 %v4738_v47  ;;  %v4741_v31 = vld [vmem:[#allocation44_spill] sm:$0xff] }
 0x26a   :  { %3616 = vmatprep.subr.mxu1 %v3955_v41  ;;  %3571 = vmatpush3.msra.mxu0 %v4738_v47 }
 0x26b   :  { %3617 = vmatpush3.msra.mxu1 %v3955_v41  ;;  %3572 = vmatprep.subr.mxu0 %v4739_v57  ;;  %v4743_v41 = vld [vmem:[#allocation43_spill] sm:$0xff] }
 0x26c   :  { %3619 = vmatmul.mubr.f32.vlgmr.msra.gmra.mxu1 %v4335_v28  ;;  %3573 = vmatpush3.msra.mxu0 %v4739_v57 }
 0x26d   :  { %3621 = vmatprep.mubr.f32.mxu1 %v4361_v33  ;;  %3574 = vmatprep.subr.mxu0 %v4740_v8 }
 0x26e   :  { %3575 = vmatpush3.msra.mxu0 %v4740_v8  ;;  %3632 = vmatprep.subr.mxu1 %v4741_v31 }
 0x26f   :  { %3576 = vmatprep.subr.mxu0 %v4742_v63  ;;  %3633 = vmatpush3.msra.mxu1 %v4741_v31 }
 0x270   :  { %3622 = vmatmul.mubr.f32.gmra.mxu1 %v4356_v38  ;;  %3577 = vmatpush3.msra.mxu0 %v4742_v63 }
 0x271   :  { %3578 = vmatprep.subr.mxu0 %v4743_v41  ;;  %3648 = vmatprep.subr.mxu1 %v4233_v53 }
 0x272   :  { %3579 = vmatpush3.msra.mxu0 %v4743_v41 }
 0x273   :  { %3581 = vmatmul.mubr.f32.vlgmr.msra.gmra.mxu0 %v4335_v28  ;;  %3624 = vmatprep.subr.mxu0 %v4233_v53 }
 0x274   :  { %3583 = vmatprep.mubr.f32.mxu0 %v4361_v33  ;;  %3625 = vmatpush3.msra.mxu0 %v4233_v53 }
 0x275   :  { %3640 = vmatprep.subr.mxu0 %v4236_v61 }
 0x277   :  { %3584 = vmatmul.mubr.f32.gmra.mxu0 %v4356_v38 }
 0x2e6   :  { %v3468_v35 = vpop.f32.mrf.mxu1 }
 0x2e8   :  { %v1683_v23 = vpop.f32.mrf.mxu1 }
 0x2ea   :  { %v3471_v54 = vpop.f32.mrf.mxu1 }
 0x2ec   :  { %v1695_v30 = vpop.f32.mrf.mxu1 }
 0x2ee   :  { %v3430_v58 = vpop.f32.mrf.mxu0 }
 0x2ef   :  { %v1690_v33 = vadd.f32 %v3468_v35, %v3430_v58 }
 0x2f0   :  { %v1502_v7 = vpop.f32.mrf.mxu0 }
 0x2f1   :  { %v1684_v48 = vadd.f32 %v1683_v23, %v1502_v7 }
 0x2f3   :  { %v3433_v22 = vpop.f32.mrf.mxu0 }
 0x2f4   :  { %v1702_v38 = vadd.f32 %v3471_v54, %v3433_v22 }
 0x2f5   :  { %v1522_v17 = vpop.f32.mrf.mxu0 }
 0x2f6   :  { %v1696_v46 = vadd.f32 %v1695_v30, %v1522_v17 }
 0x308   :  { %v3544_v21 = vpop.f32.mrf.mxu1 }
 0x30a   :  { %v1915_v28 = vpop.f32.mrf.mxu1 }
 0x30d   :  { %v3547_v15 = vpop.f32.mrf.mxu1 }
 0x30f   :  { %v1931_v6 = vpop.f32.mrf.mxu1 }
 0x311   :  { %v3506_v12 = vpop.f32.mrf.mxu0 }
 0x312   :  { %v1813_v51 = vadd.f32 %v3506_v12, %v1690_v33 }
 0x313   :  { %v1805_v60 = vpop.f32.mrf.mxu0 }
 0x314   :  { %v1806_v32 = vadd.f32 %v1805_v60, %v1684_v48  ;;  %v1924_v20 = vadd.f32 %v3544_v21, %v1813_v51 }
 0x316   :  { %v3509_v40 = vpop.f32.mrf.mxu0  ;;  %v1916_v0 = vadd.f32 %v1915_v28, %v1806_v32 }
 0x317   :  { %v1827_v19 = vadd.f32 %v3509_v40, %v1702_v38 }
 0x318   :  { %v1819_v29 = vpop.f32.mrf.mxu0 }
 0x319   :  { %v1820_v14 = vadd.f32 %v1819_v29, %v1696_v46  ;;  %v1940_v50 = vadd.f32 %v3547_v15, %v1827_v19 }
 0x31b   :  { %v1932_v3 = vadd.f32 %v1931_v6, %v1820_v14 }
 0x32c   :  { %v3620_v59 = vpop.f32.mrf.mxu1 }
 0x32e   :  { %v2163_v25 = vpop.f32.mrf.mxu1 }
 0x330   :  { %v3623_v42 = vpop.f32.mrf.mxu1 }
 0x332   :  { %v2175_v56 = vpop.f32.mrf.mxu1 }
 0x333   :  { %v3582_v18 = vpop.f32.mrf.mxu0 }
 0x334   :  { %v2065_v43 = vadd.f32 %v3582_v18, %v1924_v20 }
 0x335   :  { %v2058_v1 = vpop.f32.mrf.mxu0 }
 0x336   :  { %v2170_v55 = vadd.f32 %v3620_v59, %v2065_v43  ;;  %v2059_v36 = vadd.f32 %v2058_v1, %v1916_v0 }
 0x337   :  { %v3585_v49 = vpop.f32.mrf.mxu0 }
 0x338   :  { %v2186_v39 = vmul.f32 0.03125, %v2170_v55  ;;  %v2164_v37 = vadd.f32 %v2163_v25, %v2059_v36  ;;  %v2077_v44 = vadd.f32 %v3585_v49, %v1940_v50 }
 0x339   :  { %v2070_v4 = vpop.f32.mrf.mxu0 }
 0x33a   :  { %v2190_v5 = vadd.f32 1e-06, %v2186_v39  ;;  %v2185_v9 = vmul.f32 0.03125, %v2164_v37  ;;  %v2182_v10 = vadd.f32 %v3623_v42, %v2077_v44  ;;  %v2071_v11 = vadd.f32 %v2070_v4, %v1932_v3 }
 0x33c   :  { %3672 = vrsqrt.f32 %v2190_v5  ;;  %v2189_v16 = vadd.f32 1e-06, %v2185_v9  ;;  %v2188_v24 = vmul.f32 0.03125, %v2182_v10  ;;  %v2176_v27 = vadd.f32 %v2175_v56, %v2071_v11 }
 0x33e   :  { %3674 = vrsqrt.f32 %v2189_v16  ;;  %v2192_v34 = vadd.f32 1e-06, %v2188_v24  ;;  %v2187_v45 = vmul.f32 0.03125, %v2176_v27 }
 0x340   :  { %3676 = vrsqrt.f32 %v2192_v34  ;;  %v2191_v47 = vadd.f32 1e-06, %v2187_v45 }
 0x342   :  { %3678 = vrsqrt.f32 %v2191_v47 }
 0x349   :  { %v3673_v57 = vpop.eup %3672 }
 0x34a   :  { %v2201_v8 = vsel %vm815_vm1, %v3673_v57, 0 }
 0x34b   :  { %v3675_v31 = vpop.eup %3674  ;;  %v2285_v63 = vand.u32 4294901760, %v2201_v8 }
 0x34c   :  { %v2198_v41 = vsel %vm815_vm1, %v3675_v31, 0 }
 0x34d   :  { %v3677_v35 = vpop.eup %3676  ;;  %v2275_v23 = vand.u32 4294901760, %v2198_v41  ;;  %v2286_v58 = vsub.f32 %v2201_v8, %v2285_v63 }
 0x34e   :  { %v2207_v54 = vsel %vm815_vm1, %v3677_v35, 0 }
 0x34f   :  { %v3679_v7 = vpop.eup %3678  ;;  %3634 = vmatprep.mubr.f32.mxu1 %v2275_v23  ;;  %v2305_v30 = vand.u32 4294901760, %v2207_v54  ;;  %v2276_v22 = vsub.f32 %v2198_v41, %v2275_v23  ;;  %v2287_v21 = vand.u32 4294901760, %v2286_v58 }
 0x350   :  { %3635 = vmatmul.mubr.f32.vlgmr.msra.gmra.mxu1 %v2285_v63  ;;  %v2204_v17 = vsel %vm815_vm1, %v3679_v7, 0  ;;  %v2819_v7 = vld [vmem:[%s4566_s2] ss:$0 sm:$0xff] }
 0x351   :  { %v2295_v28 = vand.u32 4294901760, %v2204_v17  ;;  %v2277_v12 = vand.u32 4294901760, %v2276_v22  ;;  %3649 = vmatpush3.msra.mxu1 %v4233_v53  ;;  %v2306_v15 = vsub.f32 %v2207_v54, %v2305_v30  ;;  %v2288_v60 = vsub.f32 %v2286_v58, %v2287_v21 }
 0x352   :  { %3664 = vmatprep.subr.mxu1 %v4233_v53 }
 0x353   :  { %3637 = vmatprep.mubr.f32.mxu1 %v2295_v28  ;;  %v2278_v33 = vsub.f32 %v2276_v22, %v2277_v12  ;;  %v2296_v6 = vsub.f32 %v2204_v17, %v2295_v28  ;;  %v2307_v40 = vand.u32 4294901760, %v2306_v15  ;;  %v2289_v59 = vand.u32 4294901760, %v2288_v60 }
 0x354   :  { %3638 = vmatmul.mubr.f32.gmra.mxu1 %v2305_v30 }
 0x355   :  { %3650 = vmatprep.mubr.f32.mxu1 %v2277_v12  ;;  %v2279_v48 = vand.u32 4294901760, %v2278_v33  ;;  %v2297_v51 = vand.u32 4294901760, %v2296_v6  ;;  %v2308_v38 = vsub.f32 %v2306_v15, %v2307_v40 }
 0x357   :  { %3626 = vmatprep.mubr.f32.mxu0 %v2279_v48  ;;  %v2298_v32 = vsub.f32 %v2296_v6, %v2297_v51  ;;  %v2309_v46 = vand.u32 4294901760, %v2308_v38 }
 0x358   :  { %3627 = vmatmul.mubr.f32.vlgmr.msra.gmra.mxu0 %v2289_v59  ;;  %3651 = vmatmul.mubr.f32.vlgmr.msra.gmra.mxu1 %v2287_v21 }
 0x359   :  { %3641 = vmatpush3.msra.mxu0 %v4236_v61  ;;  %3653 = vmatprep.mubr.f32.mxu1 %v2297_v51  ;;  %v2299_v29 = vand.u32 4294901760, %v2298_v32 }
 0x35a   :  { %3656 = vmatprep.subr.mxu0 %v4241_v62  ;;  %3665 = vmatpush3.msra.mxu1 %v4233_v53 }
 0x35b   :  { %3629 = vmatprep.mubr.f32.mxu0 %v2299_v29 }
 0x35c   :  { %3630 = vmatmul.mubr.f32.gmra.mxu0 %v2309_v46  ;;  %3654 = vmatmul.mubr.f32.gmra.mxu1 %v2307_v40 }
 0x35d   :  { %3642 = vmatprep.mubr.f32.mxu0 %v2276_v22  ;;  %3666 = vmatprep.mubr.f32.mxu1 %v2275_v23 }
 0x360   :  { %3643 = vmatmul.mubr.f32.vlgmr.msra.gmra.mxu0 %v2286_v58  ;;  %3667 = vmatmul.mubr.f32.vlgmr.msra.gmra.mxu1 %v2285_v63 }
 0x361   :  { %3657 = vmatpush3.msra.mxu0 %v4241_v62  ;;  %3645 = vmatprep.mubr.f32.mxu0 %v2296_v6 }
 0x362   :  { %3669 = vmatprep.mubr.f32.mxu1 %v2295_v28 }
 0x364   :  { %3646 = vmatmul.mubr.f32.gmra.mxu0 %v2306_v15  ;;  %3670 = vmatmul.mubr.f32.gmra.mxu1 %v2305_v30 }
 0x365   :  { %3658 = vmatprep.mubr.f32.mxu0 %v2275_v23 }
 0x368   :  { %3659 = vmatmul.mubr.f32.vlgmr.msra.gmra.mxu0 %v2285_v63  ;;  %v2818_v63 = vld [vmem:[%s4565_s1] ss:$0 sm:$0xff] }
 0x369   :  { %3661 = vmatprep.mubr.f32.mxu0 %v2295_v28 }
 0x36c   :  { %3662 = vmatmul.mubr.f32.gmra.mxu0 %v2305_v30 }
 0x410   :  { %v3636_v61 = vpop.f32.mrf.mxu1 }
 0x412   :  { %v2387_v19 = vpop.f32.mrf.mxu1 }
 0x414   :  { %v3639_v53 = vpop.f32.mrf.mxu1 }
 0x416   :  { %v2399_v20 = vpop.f32.mrf.mxu1 }
 0x418   :  { %v3628_v25 = vpop.f32.mrf.mxu0  ;;  %v3652_v18 = vpop.f32.mrf.mxu1 }
 0x419   :  { %v2394_v50 = vadd.f32 %v3636_v61, %v3628_v25 }
 0x41a   :  { %v2281_v14 = vpop.f32.mrf.mxu0  ;;  %v2574_v43 = vpop.f32.mrf.mxu1 }
 0x41b   :  { %v2388_v49 = vadd.f32 %v2387_v19, %v2281_v14 }
 0x41c   :  { %v3631_v0 = vpop.f32.mrf.mxu0  ;;  %v3655_v1 = vpop.f32.mrf.mxu1 }
 0x41d   :  { %v2406_v3 = vadd.f32 %v3639_v53, %v3631_v0 }
 0x41e   :  { %v2301_v55 = vpop.f32.mrf.mxu0  ;;  %v2590_v62 = vpop.f32.mrf.mxu1 }
 0x41f   :  { %v2400_v9 = vadd.f32 %v2399_v20, %v2301_v55 }
 0x420   :  { %v3644_v36 = vpop.f32.mrf.mxu0  ;;  %v3668_v37 = vpop.f32.mrf.mxu1 }
 0x421   :  { %v2487_v39 = vadd.f32 %v3644_v36, %v2394_v50 }
 0x422   :  { %v2479_v42 = vpop.f32.mrf.mxu0  ;;  %v2762_v56 = vpop.f32.mrf.mxu1 }
 0x423   :  { %v2480_v4 = vadd.f32 %v2479_v42, %v2388_v49  ;;  %v2583_v11 = vadd.f32 %v3652_v18, %v2487_v39 }
 0x424   :  { %v3647_v44 = vpop.f32.mrf.mxu0  ;;  %v3671_v31 = vpop.f32.mrf.mxu1 }
 0x425   :  { %v2501_v10 = vadd.f32 %v3647_v44, %v2406_v3  ;;  %v2575_v34 = vadd.f32 %v2574_v43, %v2480_v4 }
 0x426   :  { %v2493_v5 = vpop.f32.mrf.mxu0  ;;  %v2774_v12 = vpop.f32.mrf.mxu1 }
 0x427   :  { %v2494_v24 = vadd.f32 %v2493_v5, %v2400_v9  ;;  %v2599_v8 = vadd.f32 %v3655_v1, %v2501_v10 }
 0x428   :  { %v3660_v16 = vpop.f32.mrf.mxu0 }
 0x429   :  { %v2679_v27 = vadd.f32 %v3660_v16, %v2583_v11  ;;  %v2591_v54 = vadd.f32 %v2590_v62, %v2494_v24 }
 0x42a   :  { %v2672_v45 = vpop.f32.mrf.mxu0 }
 0x42b   :  { %v2769_v47 = vadd.f32 %v3668_v37, %v2679_v27  ;;  %v2673_v57 = vadd.f32 %v2672_v45, %v2575_v34 }
 0x42c   :  { %v3663_v41 = vpop.f32.mrf.mxu0 }
 0x42d   :  { %v2785_v35 = vmul.f32 %v2769_v47, %v4328_v52  ;;  %v2763_v23 = vadd.f32 %v2762_v56, %v2673_v57  ;;  %v2691_v58 = vadd.f32 %v3663_v41, %v2599_v8 }
 0x42e   :  { %v2684_v30 = vpop.f32.mrf.mxu0 }
 0x42f   :  { %v2796_v22 = vmul.f32 %v2818_v63, %v2785_v35  ;;  %v2784_v21 = vmul.f32 %v2763_v23, %v4333_v2  ;;  %v2781_v17 = vadd.f32 %v3671_v31, %v2691_v58  ;;  %v2685_v28 = vadd.f32 %v2684_v30, %v2591_v54 }
 0x431   :  { %v2807_v15 = vadd.f32 %v2819_v7, %v2796_v22  ;;  %v2795_v60 = vmul.f32 %v2818_v63, %v2784_v21  ;;  %v2787_v33 = vmul.f32 %v2781_v17, %v4340_v26  ;;  %v2775_v6 = vadd.f32 %v2774_v12, %v2685_v28 }
 0x433   :  { %2811 = vst [vmem:[%s4567_s5 + $0x8] sm:$0xff] %v2807_v15  ;;  %v2806_v52 = vadd.f32 %v2819_v7, %v2795_v60  ;;  %v2798_v40 = vmul.f32 %v2818_v63, %v2787_v33  ;;  %v2786_v48 = vmul.f32 %v2775_v6, %v4348_v13 }
 0x435   :  { %2810 = vst [vmem:[%s4567_s5] sm:$0xff] %v2806_v52  ;;  %v2809_v2 = vadd.f32 %v2819_v7, %v2798_v40  ;;  %v2797_v51 = vmul.f32 %v2818_v63, %v2786_v48 }
 0x437   :  { %2813 = vst [vmem:[%s4567_s5 + $0x18] sm:$0xff] %v2809_v2  ;;  %v2808_v26 = vadd.f32 %v2819_v7, %v2797_v51 }
 0x439   :  { %2812 = vst [vmem:[%s4567_s5 + $0x10] sm:$0xff] %v2808_v26 }

</bundles_post_ra>
